<compile_context>
chip_gen: v5e
topology: v5e:2x2
jax: 0.10.0
libtpu: 0.0.40
codegen_flags: <defaults>
</compile_context>

<pallas_src>
import jax
import jax.numpy as jnp
from jax.experimental import pallas as pl
from jax.experimental.pallas import tpu as pltpu

D_MODEL = 32
D_FF = 64
N_HEADS = 4
D_HEAD = D_MODEL // N_HEADS
EPS = 1e-6
NEG_INF = -1e9
SM_SCALE = 1.0 / (D_HEAD ** 0.5)


# ------------------------------- kernel -------------------------------

def _layernorm(x, gamma, beta):
    # Biased variance, eps inside the rsqrt (matches the reference).
    mean = jnp.mean(x, axis=-1, keepdims=True)
    var = jnp.mean((x - mean) ** 2, axis=-1, keepdims=True)
    return (x - mean) * jax.lax.rsqrt(var + EPS) * gamma + beta


def _mha_core(q, k, v, bias):
    """Attention on head-concat activations with batch folded into the row axis.

    q: (N, D)  k, v: (M, D)   (N = B*Sq, M = B*Skv, columns = heads-major concat)
    bias: (N, M) additive mask bias: 0 where attended, -1e9 at masked positions
          and at cross-batch positions (block-diagonal over the batch).
    Returns (N, D) head-concat attention output (before the output projection).
    """
    # Head split: lane slices stacked on a new leading batch axis (XLU-slack relayout).
    qh = jnp.stack([q[:, h * D_HEAD:(h + 1) * D_HEAD] for h in range(N_HEADS)], axis=0)
    kh = jnp.stack([k[:, h * D_HEAD:(h + 1) * D_HEAD] for h in range(N_HEADS)], axis=0)
    vh = jnp.stack([v[:, h * D_HEAD:(h + 1) * D_HEAD] for h in range(N_HEADS)], axis=0)

    s = jnp.einsum('hqd,hkd->hqk', qh, kh,
                   preferred_element_type=jnp.float32) * SM_SCALE       # (H, N, M)
    s = s + bias[None]                                                  # mask + batch isolation
    s = s - jnp.max(s, axis=-1, keepdims=True)
    p = jnp.exp(s)
    p = p / jnp.sum(p, axis=-1, keepdims=True)                          # exact division (parity)
    o = jnp.einsum('hqk,hkd->hqd', p, vh,
                   preferred_element_type=jnp.float32)                  # (H, N, Dh)
    # Head merge back to lane-concat layout for the single (N,D)@(D,D) output projection.
    return jnp.concatenate([o[h] for h in range(N_HEADS)], axis=-1)     # (N, D)


def decoder_block_kernel(x_ref, ek_ref, ev_ref, tbias_ref, sbias_ref,
                         vecp_ref, wqkv_ref, wdd_ref, w1_ref, bf1_ref, w2_ref,
                         o_ref):
    """Full decoder block (self-attn + cross-attn + FFN) for the whole batch.

    vecp rows: 0 g1, 1 be1, 2 g2, 3 be2, 4 g3, 5 be3,
               6 bq_s, 7 bk_s, 8 bv_s, 9 bo_s,
               10 bq_c, 11 bk_c, 12 bv_c, 13 bo_c, 14 bf2
    wdd slices: 0 wo_s, 1 wq_c, 2 wk_c, 3 wv_c, 4 wo_c
    """
    x = x_ref[...]            # (N, D)   N = B*Sq
    ek = ek_ref[...]          # (M, D)   M = B*Skv  (encoder output used for keys)
    ev = ev_ref[...]          # (M, D)   (encoder output used for values)
    vp = vecp_ref[...]        # (15, D)

    d = D_MODEL

    # ---------------- 1) self-attention residual ----------------
    xn = _layernorm(x, vp[0:1], vp[1:2])
    qkv = jnp.dot(xn, wqkv_ref[...], preferred_element_type=jnp.float32)   # (N, 3D) one push
    q = qkv[:, 0 * d:1 * d] + vp[6:7]
    k = qkv[:, 1 * d:2 * d] + vp[7:8]
    v = qkv[:, 2 * d:3 * d] + vp[8:9]
    attn = _mha_core(q, k, v, tbias_ref[...])
    x = x + jnp.dot(attn, wdd_ref[0], preferred_element_type=jnp.float32) + vp[9:10]

    # ---------------- 2) cross-attention residual ----------------
    xn = _layernorm(x, vp[2:3], vp[3:4])
    q = jnp.dot(xn, wdd_ref[1], preferred_element_type=jnp.float32) + vp[10:11]
    k = jnp.dot(ek, wdd_ref[2], preferred_element_type=jnp.float32) + vp[11:12]
    v = jnp.dot(ev, wdd_ref[3], preferred_element_type=jnp.float32) + vp[12:13]
    attn = _mha_core(q, k, v, sbias_ref[...])
    x = x + jnp.dot(attn, wdd_ref[4], preferred_element_type=jnp.float32) + vp[13:14]

    # ---------------- 3) feed-forward residual ----------------
    xn = _layernorm(x, vp[4:5], vp[5:6])
    h = jnp.dot(xn, w1_ref[...], preferred_element_type=jnp.float32) + bf1_ref[...]
    h = jnp.maximum(h, 0.0)
    x = x + jnp.dot(h, w2_ref[...], preferred_element_type=jnp.float32) + vp[14:15]

    o_ref[...] = x.astype(o_ref.dtype)


# --------------------------- wrapper-side packing ---------------------------

def _block_diag_bias(mask):
    """(B, Sq, Skv) {0,1}-ish mask -> (B*Sq, B*Skv) additive bias.

    0 where (same batch AND mask != 0), -1e9 elsewhere (masked or cross-batch).
    Precomputed in the wrapper so the kernel does `s += bias` (no compare+select)."""
    B, Sq, Skv = mask.shape
    keep = (mask != 0).astype(jnp.float32)                  # robust to bool/int/float masks
    eye = jnp.eye(B, dtype=jnp.float32)
    big = (eye[:, None, :, None] * keep[:, :, None, :]).reshape(B * Sq, B * Skv)
    return (big - 1.0) * 1e9


def _full(shape):
    zeros = (0,) * len(shape)
    return pl.BlockSpec(shape, lambda i, z=zeros: z)


@jax.jit
def decoder_block(x, k, v, trg_mask, src_mask, params):
    """Mirrors DecoderBlock.forward: self-attn -> cross-attn -> feed-forward,
    each with a pre-norm residual connection. K comes from `k`, V from `v`."""
    B, Sq, D = x.shape
    Skv = k.shape[1]
    assert D == D_MODEL

    g1, be1 = params["ln1"]
    g2, be2 = params["ln2"]
    g3, be3 = params["ln3"]
    wq_s, bq_s, wk_s, bk_s, wv_s, bv_s, wo_s, bo_s = params["self_attn"]
    wq_c, bq_c, wk_c, bk_c, wv_c, bv_c, wo_c, bo_c = params["cross_attn"]
    w1, bf1, w2, bf2 = params["ffn"]

    # 2D slabs: batch folded into rows (free wrapper-side reshapes).
    x2d = x.reshape(B * Sq, D)
    ek2d = k.reshape(B * Skv, D)
    ev2d = v.reshape(B * Skv, D)

    # Pre-biased, block-diagonal-over-batch masks.
    tbias = _block_diag_bias(trg_mask)            # (B*Sq, B*Sq)
    sbias = _block_diag_bias(src_mask)            # (B*Sq, B*Skv)

    # Packed parameters (layout plumbing outside the kernel).
    vec_params = jnp.stack([g1, be1, g2, be2, g3, be3,
                            bq_s, bk_s, bv_s, bo_s,
                            bq_c, bk_c, bv_c, bo_c,
                            bf2], axis=0)                        # (15, D)
    wqkv_s = jnp.concatenate([wq_s, wk_s, wv_s], axis=1)         # (D, 3D)
    w_dd = jnp.stack([wo_s, wq_c, wk_c, wv_c, wo_c], axis=0)     # (5, D, D)
    bf1_2d = bf1.reshape(1, D_FF)

    operands = (x2d, ek2d, ev2d, tbias, sbias,
                vec_params, wqkv_s, w_dd, w1, bf1_2d, w2)

    in_specs = [
        _full((B * Sq, D)),          # x
        _full((B * Skv, D)),         # encoder output for K
        _full((B * Skv, D)),         # encoder output for V
        _full((B * Sq, B * Sq)),     # trg mask bias
        _full((B * Sq, B * Skv)),    # src mask bias
        _full((15, D)),              # LN params + all (D,)-shaped biases
        _full((D, 3 * D)),           # packed self-attn QKV weight
        _full((5, D, D)),            # wo_s, wq_c, wk_c, wv_c, wo_c
        _full((D, D_FF)),            # ffn W1
        _full((1, D_FF)),            # ffn b1
        _full((D_FF, D)),            # ffn W2
    ]

    out2d = pl.pallas_call(
        decoder_block_kernel,
        out_shape=jax.ShapeDtypeStruct((B * Sq, D), x.dtype),
        grid=(1,),                                  # single invocation: whole batch at once
        in_specs=in_specs,
        out_specs=_full((B * Sq, D)),
        compiler_params=pltpu.CompilerParams(
            dimension_semantics=("arbitrary",)),
    )(*operands)

    return out2d.reshape(B, Sq, D)


# ------------------------------ params & reference ------------------------------

def init_params(key, d_model=D_MODEL, d_ff=D_FF):
    def dense(kk, din, dout):
        kw, kb = jax.random.split(kk)
        return (0.02 * jax.random.normal(kw, (din, dout), jnp.float32),
                0.02 * jax.random.normal(kb, (dout,), jnp.float32))

    k_self, k_cross, k_f1, k_f2 = jax.random.split(key, 4)

    def mha_params(kk):
        ks = jax.random.split(kk, 4)
        wq, bq = dense(ks[0], d_model, d_model)
        wk, bk = dense(ks[1], d_model, d_model)
        wv, bv = dense(ks[2], d_model, d_model)
        wo, bo = dense(ks[3], d_model, d_model)
        return (wq, bq, wk, bk, wv, bv, wo, bo)

    ln = (jnp.ones((d_model,), jnp.float32), jnp.zeros((d_model,), jnp.float32))
    w1, b1 = dense(k_f1, d_model, d_ff)
    w2, b2 = dense(k_f2, d_ff, d_model)
    return {
        "ln1": ln, "ln2": ln, "ln3": ln,
        "self_attn": mha_params(k_self),
        "cross_attn": mha_params(k_cross),
        "ffn": (w1, b1, w2, b2),
    }


def _reference(x, k, v, trg_mask, src_mask, params):
    """Pure-JAX mirror of the PyTorch DecoderBlock forward (eval mode)."""
    hp = jax.lax.Precision.HIGHEST

    def layernorm(t, g, b):
        m = jnp.mean(t, -1, keepdims=True)
        var = jnp.mean((t - m) ** 2, -1, keepdims=True)
        return (t - m) / jnp.sqrt(var + EPS) * g + b

    def mha(q_in, k_in, v_in, mask, p):
        wq, bq, wk, bk, wv, bv, wo, bo = p

        def split(t):
            b, s, _ = t.shape
            return t.reshape(b, s, N_HEADS, D_HEAD).transpose(0, 2, 1, 3)

        q = split(jnp.einsum('bsd,de->bse', q_in, wq, precision=hp) + bq)
        kk = split(jnp.einsum('bsd,de->bse', k_in, wk, precision=hp) + bk)
        vv = split(jnp.einsum('bsd,de->bse', v_in, wv, precision=hp) + bv)
        s = jnp.einsum('bhqd,bhkd->bhqk', q, kk, precision=hp) * SM_SCALE
        s = jnp.where(mask[:, None] == 0, NEG_INF, s)
        a = jax.nn.softmax(s, axis=-1)
        o = jnp.einsum('bhqk,bhkd->bhqd', a, vv, precision=hp)
        o = o.transpose(0, 2, 1, 3).reshape(q_in.shape[0], -1, D_MODEL)
        return jnp.einsum('bsd,de->bse', o, wo, precision=hp) + bo

    g1, be1 = params["ln1"]; g2, be2 = params["ln2"]; g3, be3 = params["ln3"]
    w1, bf1, w2, bf2 = params["ffn"]

    xn = layernorm(x, g1, be1)
    x = x + mha(xn, xn, xn, trg_mask, params["self_attn"])
    xn = layernorm(x, g2, be2)
    x = x + mha(xn, k, v, src_mask, params["cross_attn"])
    xn = layernorm(x, g3, be3)
    h = jnp.maximum(jnp.einsum('bsd,df->bsf', xn, w1, precision=hp) + bf1, 0.0)
    x = x + jnp.einsum('bsf,fd->bsd', h, w2, precision=hp) + bf2
    return x


if __name__ == "__main__":
    B, S_TRG, S_SRC = 2, 8, 8

    key = jax.random.PRNGKey(0)
    kx, kk_, kv_, kp = jax.random.split(key, 4)
    x = jax.random.normal(kx, (B, S_TRG, D_MODEL), jnp.float32)
    k = jax.random.normal(kk_, (B, S_SRC, D_MODEL), jnp.float32)   # encoder output (keys)
    v = jax.random.normal(kv_, (B, S_SRC, D_MODEL), jnp.float32)   # encoder output (values)

    # trg_mask: causal; src_mask: all-ones (no padding). Float {0,1}.
    trg_mask = jnp.broadcast_to(
        jnp.tril(jnp.ones((S_TRG, S_TRG), jnp.float32)), (B, S_TRG, S_TRG))
    src_mask = jnp.ones((B, S_TRG, S_SRC), jnp.float32)

    params = init_params(kp)

    out = decoder_block(x, k, v, trg_mask, src_mask, params)
    out = jax.block_until_ready(out)
    assert out.shape == (B, S_TRG, D_MODEL)
    assert bool(jnp.all(jnp.isfinite(out)))

    ref = _reference(x, k, v, trg_mask, src_mask, params)
    err = float(jnp.max(jnp.abs(out - ref)))
    assert err < 5e-3, f"mismatch vs reference: max abs err = {err}"

    print("KERNEL_OK")
</pallas_src>

<mosaic_0001>
module attributes {stable_mosaic.version = 11 : i64} {
  func.func @decoder_block_kernel(%arg0: i32, %arg1: memref<16x32xf32, #tpu.memory_space<vmem>>, %arg2: memref<16x32xf32, #tpu.memory_space<vmem>>, %arg3: memref<16x32xf32, #tpu.memory_space<vmem>>, %arg4: memref<16x16xf32, #tpu.memory_space<vmem>>, %arg5: memref<16x16xf32, #tpu.memory_space<vmem>>, %arg6: memref<15x32xf32, #tpu.memory_space<vmem>>, %arg7: memref<32x96xf32, #tpu.memory_space<vmem>>, %arg8: memref<5x32x32xf32, #tpu.memory_space<vmem>>, %arg9: memref<32x64xf32, #tpu.memory_space<vmem>>, %arg10: memref<1x64xf32, #tpu.memory_space<vmem>>, %arg11: memref<64x32xf32, #tpu.memory_space<vmem>>, %arg12: memref<16x32xf32, #tpu.memory_space<vmem>>) attributes {dimension_semantics = [#tpu.dimension_semantics<arbitrary>], iteration_bounds = array<i64: 1>, scalar_prefetch = 0 : i64, scratch_operands = 0 : i64, tpu.core_type = #tpu.core_type<tc>, window_params = [{pipeline_mode = #tpu.pipeline_mode<synchronous>, transform_indices = @transform_0, window_bounds = array<i64: 16, 32>}, {pipeline_mode = #tpu.pipeline_mode<synchronous>, transform_indices = @transform_1, window_bounds = array<i64: 16, 32>}, {pipeline_mode = #tpu.pipeline_mode<synchronous>, transform_indices = @transform_2, window_bounds = array<i64: 16, 32>}, {pipeline_mode = #tpu.pipeline_mode<synchronous>, transform_indices = @transform_3, window_bounds = array<i64: 16, 16>}, {pipeline_mode = #tpu.pipeline_mode<synchronous>, transform_indices = @transform_4, window_bounds = array<i64: 16, 16>}, {pipeline_mode = #tpu.pipeline_mode<synchronous>, transform_indices = @transform_5, window_bounds = array<i64: 15, 32>}, {pipeline_mode = #tpu.pipeline_mode<synchronous>, transform_indices = @transform_6, window_bounds = array<i64: 32, 96>}, {pipeline_mode = #tpu.pipeline_mode<synchronous>, transform_indices = @transform_7, window_bounds = array<i64: 5, 32, 32>}, {pipeline_mode = #tpu.pipeline_mode<synchronous>, transform_indices = @transform_8, window_bounds = array<i64: 32, 64>}, {pipeline_mode = #tpu.pipeline_mode<synchronous>, transform_indices = @transform_9, window_bounds = array<i64: 1, 64>}, {pipeline_mode = #tpu.pipeline_mode<synchronous>, transform_indices = @transform_10, window_bounds = array<i64: 64, 32>}, {pipeline_mode = #tpu.pipeline_mode<synchronous>, transform_indices = @transform_11, window_bounds = array<i64: 16, 32>}]} {
    %c0 = arith.constant 0 : index
    %c0_0 = arith.constant 0 : index
    %0 = vector.load %arg1[%c0, %c0_0] : memref<16x32xf32, #tpu.memory_space<vmem>>, vector<16x32xf32>
    %c0_1 = arith.constant 0 : index
    %c0_2 = arith.constant 0 : index
    %1 = vector.load %arg2[%c0_1, %c0_2] : memref<16x32xf32, #tpu.memory_space<vmem>>, vector<16x32xf32>
    %c0_3 = arith.constant 0 : index
    %c0_4 = arith.constant 0 : index
    %2 = vector.load %arg3[%c0_3, %c0_4] : memref<16x32xf32, #tpu.memory_space<vmem>>, vector<16x32xf32>
    %c0_5 = arith.constant 0 : index
    %c0_6 = arith.constant 0 : index
    %3 = vector.load %arg6[%c0_5, %c0_6] : memref<15x32xf32, #tpu.memory_space<vmem>>, vector<15x32xf32>
    %4 = vector.extract_strided_slice %3 {offsets = [0, 0], sizes = [1, 32], strides = [1, 1]} : vector<15x32xf32> to vector<1x32xf32>
    %5 = vector.extract_strided_slice %3 {offsets = [1, 0], sizes = [1, 32], strides = [1, 1]} : vector<15x32xf32> to vector<1x32xf32>
    %cst = arith.constant dense<0.000000e+00> : vector<16xf32>
    %6 = vector.multi_reduction <add>, %0, %cst [1] : vector<16x32xf32> to vector<16xf32>
    %7 = vector.shape_cast %6 : vector<16xf32> to vector<16x1xf32>
    %cst_7 = arith.constant 3.200000e+01 : f32
    %8 = vector.broadcast %cst_7 : f32 to vector<16x1xf32>
    %9 = arith.divf %7, %8 : vector<16x1xf32>
    %10 = vector.broadcast %9 : vector<16x1xf32> to vector<16x32xf32>
    %11 = arith.subf %0, %10 : vector<16x32xf32>
    %12 = arith.mulf %11, %11 : vector<16x32xf32>
    %cst_8 = arith.constant dense<0.000000e+00> : vector<16xf32>
    %13 = vector.multi_reduction <add>, %12, %cst_8 [1] : vector<16x32xf32> to vector<16xf32>
    %14 = vector.shape_cast %13 : vector<16xf32> to vector<16x1xf32>
    %cst_9 = arith.constant 3.200000e+01 : f32
    %15 = vector.broadcast %cst_9 : f32 to vector<16x1xf32>
    %16 = arith.divf %14, %15 : vector<16x1xf32>
    %17 = vector.broadcast %9 : vector<16x1xf32> to vector<16x32xf32>
    %18 = arith.subf %0, %17 : vector<16x32xf32>
    %cst_10 = arith.constant 9.99999997E-7 : f32
    %19 = vector.broadcast %cst_10 : f32 to vector<16x1xf32>
    %20 = arith.addf %16, %19 : vector<16x1xf32>
    %21 = math.rsqrt %20 : vector<16x1xf32>
    %22 = vector.broadcast %21 : vector<16x1xf32> to vector<16x32xf32>
    %23 = arith.mulf %18, %22 : vector<16x32xf32>
    %24 = vector.broadcast %4 : vector<1x32xf32> to vector<16x32xf32>
    %25 = arith.mulf %23, %24 : vector<16x32xf32>
    %26 = vector.broadcast %5 : vector<1x32xf32> to vector<16x32xf32>
    %27 = arith.addf %25, %26 : vector<16x32xf32>
    %c0_11 = arith.constant 0 : index
    %c0_12 = arith.constant 0 : index
    %28 = vector.load %arg7[%c0_11, %c0_12] : memref<32x96xf32, #tpu.memory_space<vmem>>, vector<32x96xf32>
    %cst_13 = arith.constant dense<0.000000e+00> : vector<16x96xf32>
    %29 = tpu.matmul %27, %28, %cst_13 {dimension_numbers = #tpu.dot_dimension_numbers<[1], [0], [0], [1], [0, 0, 1, 1], [], []>} : vector<16x32xf32>, vector<32x96xf32>, vector<16x96xf32> -> vector<16x96xf32>
    %30 = vector.extract_strided_slice %29 {offsets = [0, 0], sizes = [16, 32], strides = [1, 1]} : vector<16x96xf32> to vector<16x32xf32>
    %31 = vector.extract_strided_slice %3 {offsets = [6, 0], sizes = [1, 32], strides = [1, 1]} : vector<15x32xf32> to vector<1x32xf32>
    %32 = vector.broadcast %31 : vector<1x32xf32> to vector<16x32xf32>
    %33 = arith.addf %30, %32 : vector<16x32xf32>
    %34 = vector.extract_strided_slice %29 {offsets = [0, 32], sizes = [16, 32], strides = [1, 1]} : vector<16x96xf32> to vector<16x32xf32>
    %35 = vector.extract_strided_slice %3 {offsets = [7, 0], sizes = [1, 32], strides = [1, 1]} : vector<15x32xf32> to vector<1x32xf32>
    %36 = vector.broadcast %35 : vector<1x32xf32> to vector<16x32xf32>
    %37 = arith.addf %34, %36 : vector<16x32xf32>
    %38 = vector.extract_strided_slice %29 {offsets = [0, 64], sizes = [16, 32], strides = [1, 1]} : vector<16x96xf32> to vector<16x32xf32>
    %39 = vector.extract_strided_slice %3 {offsets = [8, 0], sizes = [1, 32], strides = [1, 1]} : vector<15x32xf32> to vector<1x32xf32>
    %40 = vector.broadcast %39 : vector<1x32xf32> to vector<16x32xf32>
    %41 = arith.addf %38, %40 : vector<16x32xf32>
    %c0_14 = arith.constant 0 : index
    %c0_15 = arith.constant 0 : index
    %42 = vector.load %arg4[%c0_14, %c0_15] : memref<16x16xf32, #tpu.memory_space<vmem>>, vector<16x16xf32>
    %43 = vector.extract_strided_slice %33 {offsets = [0, 0], sizes = [16, 8], strides = [1, 1]} : vector<16x32xf32> to vector<16x8xf32>
    %44 = vector.extract_strided_slice %33 {offsets = [0, 8], sizes = [16, 8], strides = [1, 1]} : vector<16x32xf32> to vector<16x8xf32>
    %45 = vector.extract_strided_slice %33 {offsets = [0, 16], sizes = [16, 8], strides = [1, 1]} : vector<16x32xf32> to vector<16x8xf32>
    %46 = vector.extract_strided_slice %33 {offsets = [0, 24], sizes = [16, 8], strides = [1, 1]} : vector<16x32xf32> to vector<16x8xf32>
    %47 = vector.shape_cast %43 : vector<16x8xf32> to vector<1x16x8xf32>
    %48 = vector.shape_cast %44 : vector<16x8xf32> to vector<1x16x8xf32>
    %49 = vector.shape_cast %45 : vector<16x8xf32> to vector<1x16x8xf32>
    %50 = vector.shape_cast %46 : vector<16x8xf32> to vector<1x16x8xf32>
    %51 = tpu.concatenate %47, %48, %49, %50 in 0 : vector<1x16x8xf32>, vector<1x16x8xf32>, vector<1x16x8xf32>, vector<1x16x8xf32> -> vector<4x16x8xf32>
    %52 = vector.extract_strided_slice %37 {offsets = [0, 0], sizes = [16, 8], strides = [1, 1]} : vector<16x32xf32> to vector<16x8xf32>
    %53 = vector.extract_strided_slice %37 {offsets = [0, 8], sizes = [16, 8], strides = [1, 1]} : vector<16x32xf32> to vector<16x8xf32>
    %54 = vector.extract_strided_slice %37 {offsets = [0, 16], sizes = [16, 8], strides = [1, 1]} : vector<16x32xf32> to vector<16x8xf32>
    %55 = vector.extract_strided_slice %37 {offsets = [0, 24], sizes = [16, 8], strides = [1, 1]} : vector<16x32xf32> to vector<16x8xf32>
    %56 = vector.shape_cast %52 : vector<16x8xf32> to vector<1x16x8xf32>
    %57 = vector.shape_cast %53 : vector<16x8xf32> to vector<1x16x8xf32>
    %58 = vector.shape_cast %54 : vector<16x8xf32> to vector<1x16x8xf32>
    %59 = vector.shape_cast %55 : vector<16x8xf32> to vector<1x16x8xf32>
    %60 = tpu.concatenate %56, %57, %58, %59 in 0 : vector<1x16x8xf32>, vector<1x16x8xf32>, vector<1x16x8xf32>, vector<1x16x8xf32> -> vector<4x16x8xf32>
    %61 = vector.extract_strided_slice %41 {offsets = [0, 0], sizes = [16, 8], strides = [1, 1]} : vector<16x32xf32> to vector<16x8xf32>
    %62 = vector.extract_strided_slice %41 {offsets = [0, 8], sizes = [16, 8], strides = [1, 1]} : vector<16x32xf32> to vector<16x8xf32>
    %63 = vector.extract_strided_slice %41 {offsets = [0, 16], sizes = [16, 8], strides = [1, 1]} : vector<16x32xf32> to vector<16x8xf32>
    %64 = vector.extract_strided_slice %41 {offsets = [0, 24], sizes = [16, 8], strides = [1, 1]} : vector<16x32xf32> to vector<16x8xf32>
    %65 = vector.shape_cast %61 : vector<16x8xf32> to vector<1x16x8xf32>
    %66 = vector.shape_cast %62 : vector<16x8xf32> to vector<1x16x8xf32>
    %67 = vector.shape_cast %63 : vector<16x8xf32> to vector<1x16x8xf32>
    %68 = vector.shape_cast %64 : vector<16x8xf32> to vector<1x16x8xf32>
    %69 = tpu.concatenate %65, %66, %67, %68 in 0 : vector<1x16x8xf32>, vector<1x16x8xf32>, vector<1x16x8xf32>, vector<1x16x8xf32> -> vector<4x16x8xf32>
    "tpu.trace_start"() <{level = 10 : i32, message = "hqd,hkd->hqk"}> : () -> ()
    %cst_16 = arith.constant dense<0.000000e+00> : vector<4x16x16xf32>
    %70 = tpu.matmul %51, %60, %cst_16 {dimension_numbers = #tpu.dot_dimension_numbers<[2], [2], [1], [1], [0, 0, 0, 1, 1, 1], [0], [0]>} : vector<4x16x8xf32>, vector<4x16x8xf32>, vector<4x16x16xf32> -> vector<4x16x16xf32>
    "tpu.trace_stop"() : () -> ()
    %cst_17 = arith.constant 0.353553385 : f32
    %71 = vector.broadcast %cst_17 : f32 to vector<4x16x16xf32>
    %72 = arith.mulf %70, %71 : vector<4x16x16xf32>
    %73 = vector.shape_cast %42 : vector<16x16xf32> to vector<1x16x16xf32>
    %74 = vector.broadcast %73 : vector<1x16x16xf32> to vector<4x16x16xf32>
    %75 = arith.addf %72, %74 : vector<4x16x16xf32>
    %cst_18 = arith.constant dense<0xFF800000> : vector<4x16xf32>
    %76 = vector.multi_reduction <maximumf>, %75, %cst_18 [2] : vector<4x16x16xf32> to vector<4x16xf32>
    %77 = vector.shape_cast %76 : vector<4x16xf32> to vector<4x16x1xf32>
    %78 = vector.broadcast %77 : vector<4x16x1xf32> to vector<4x16x16xf32>
    %79 = arith.subf %75, %78 : vector<4x16x16xf32>
    %80 = math.exp %79 : vector<4x16x16xf32>
    %cst_19 = arith.constant dense<0.000000e+00> : vector<4x16xf32>
    %81 = vector.multi_reduction <add>, %80, %cst_19 [2] : vector<4x16x16xf32> to vector<4x16xf32>
    %82 = vector.shape_cast %81 : vector<4x16xf32> to vector<4x16x1xf32>
    %83 = vector.broadcast %82 : vector<4x16x1xf32> to vector<4x16x16xf32>
    %84 = arith.divf %80, %83 : vector<4x16x16xf32>
    "tpu.trace_start"() <{level = 10 : i32, message = "hqk,hkd->hqd"}> : () -> ()
    %cst_20 = arith.constant dense<0.000000e+00> : vector<4x16x8xf32>
    %85 = tpu.matmul %84, %69, %cst_20 {dimension_numbers = #tpu.dot_dimension_numbers<[2], [1], [1], [2], [0, 0, 0, 1, 1, 2], [0], [0]>} : vector<4x16x16xf32>, vector<4x16x8xf32>, vector<4x16x8xf32> -> vector<4x16x8xf32>
    "tpu.trace_stop"() : () -> ()
    %86 = vector.extract_strided_slice %85 {offsets = [0, 0, 0], sizes = [1, 16, 8], strides = [1, 1, 1]} : vector<4x16x8xf32> to vector<1x16x8xf32>
    %87 = vector.shape_cast %86 : vector<1x16x8xf32> to vector<16x8xf32>
    %88 = vector.extract_strided_slice %85 {offsets = [1, 0, 0], sizes = [1, 16, 8], strides = [1, 1, 1]} : vector<4x16x8xf32> to vector<1x16x8xf32>
    %89 = vector.shape_cast %88 : vector<1x16x8xf32> to vector<16x8xf32>
    %90 = vector.extract_strided_slice %85 {offsets = [2, 0, 0], sizes = [1, 16, 8], strides = [1, 1, 1]} : vector<4x16x8xf32> to vector<1x16x8xf32>
    %91 = vector.shape_cast %90 : vector<1x16x8xf32> to vector<16x8xf32>
    %92 = vector.extract_strided_slice %85 {offsets = [3, 0, 0], sizes = [1, 16, 8], strides = [1, 1, 1]} : vector<4x16x8xf32> to vector<1x16x8xf32>
    %93 = vector.shape_cast %92 : vector<1x16x8xf32> to vector<16x8xf32>
    %94 = tpu.concatenate %87, %89, %91, %93 in 1 : vector<16x8xf32>, vector<16x8xf32>, vector<16x8xf32>, vector<16x8xf32> -> vector<16x32xf32>
    %c0_21 = arith.constant 0 : index
    %c0_22 = arith.constant 0 : index
    %c0_23 = arith.constant 0 : index
    %95 = vector.load %arg8[%c0_21, %c0_22, %c0_23] : memref<5x32x32xf32, #tpu.memory_space<vmem>>, vector<1x32x32xf32>
    %96 = vector.shape_cast %95 : vector<1x32x32xf32> to vector<32x32xf32>
    %cst_24 = arith.constant dense<0.000000e+00> : vector<16x32xf32>
    %97 = tpu.matmul %94, %96, %cst_24 {dimension_numbers = #tpu.dot_dimension_numbers<[1], [0], [0], [1], [0, 0, 1, 1], [], []>} : vector<16x32xf32>, vector<32x32xf32>, vector<16x32xf32> -> vector<16x32xf32>
    %98 = arith.addf %0, %97 : vector<16x32xf32>
    %99 = vector.extract_strided_slice %3 {offsets = [9, 0], sizes = [1, 32], strides = [1, 1]} : vector<15x32xf32> to vector<1x32xf32>
    %100 = vector.broadcast %99 : vector<1x32xf32> to vector<16x32xf32>
    %101 = arith.addf %98, %100 : vector<16x32xf32>
    %102 = vector.extract_strided_slice %3 {offsets = [2, 0], sizes = [1, 32], strides = [1, 1]} : vector<15x32xf32> to vector<1x32xf32>
    %103 = vector.extract_strided_slice %3 {offsets = [3, 0], sizes = [1, 32], strides = [1, 1]} : vector<15x32xf32> to vector<1x32xf32>
    %cst_25 = arith.constant dense<0.000000e+00> : vector<16xf32>
    %104 = vector.multi_reduction <add>, %101, %cst_25 [1] : vector<16x32xf32> to vector<16xf32>
    %105 = vector.shape_cast %104 : vector<16xf32> to vector<16x1xf32>
    %cst_26 = arith.constant 3.200000e+01 : f32
    %106 = vector.broadcast %cst_26 : f32 to vector<16x1xf32>
    %107 = arith.divf %105, %106 : vector<16x1xf32>
    %108 = vector.broadcast %107 : vector<16x1xf32> to vector<16x32xf32>
    %109 = arith.subf %101, %108 : vector<16x32xf32>
    %110 = arith.mulf %109, %109 : vector<16x32xf32>
    %cst_27 = arith.constant dense<0.000000e+00> : vector<16xf32>
    %111 = vector.multi_reduction <add>, %110, %cst_27 [1] : vector<16x32xf32> to vector<16xf32>
    %112 = vector.shape_cast %111 : vector<16xf32> to vector<16x1xf32>
    %cst_28 = arith.constant 3.200000e+01 : f32
    %113 = vector.broadcast %cst_28 : f32 to vector<16x1xf32>
    %114 = arith.divf %112, %113 : vector<16x1xf32>
    %115 = vector.broadcast %107 : vector<16x1xf32> to vector<16x32xf32>
    %116 = arith.subf %101, %115 : vector<16x32xf32>
    %cst_29 = arith.constant 9.99999997E-7 : f32
    %117 = vector.broadcast %cst_29 : f32 to vector<16x1xf32>
    %118 = arith.addf %114, %117 : vector<16x1xf32>
    %119 = math.rsqrt %118 : vector<16x1xf32>
    %120 = vector.broadcast %119 : vector<16x1xf32> to vector<16x32xf32>
    %121 = arith.mulf %116, %120 : vector<16x32xf32>
    %122 = vector.broadcast %102 : vector<1x32xf32> to vector<16x32xf32>
    %123 = arith.mulf %121, %122 : vector<16x32xf32>
    %124 = vector.broadcast %103 : vector<1x32xf32> to vector<16x32xf32>
    %125 = arith.addf %123, %124 : vector<16x32xf32>
    %c1 = arith.constant 1 : index
    %c0_30 = arith.constant 0 : index
    %c0_31 = arith.constant 0 : index
    %126 = vector.load %arg8[%c1, %c0_30, %c0_31] : memref<5x32x32xf32, #tpu.memory_space<vmem>>, vector<1x32x32xf32>
    %127 = vector.shape_cast %126 : vector<1x32x32xf32> to vector<32x32xf32>
    %cst_32 = arith.constant dense<0.000000e+00> : vector<16x32xf32>
    %128 = tpu.matmul %125, %127, %cst_32 {dimension_numbers = #tpu.dot_dimension_numbers<[1], [0], [0], [1], [0, 0, 1, 1], [], []>} : vector<16x32xf32>, vector<32x32xf32>, vector<16x32xf32> -> vector<16x32xf32>
    %129 = vector.extract_strided_slice %3 {offsets = [10, 0], sizes = [1, 32], strides = [1, 1]} : vector<15x32xf32> to vector<1x32xf32>
    %130 = vector.broadcast %129 : vector<1x32xf32> to vector<16x32xf32>
    %131 = arith.addf %128, %130 : vector<16x32xf32>
    %c2 = arith.constant 2 : index
    %c0_33 = arith.constant 0 : index
    %c0_34 = arith.constant 0 : index
    %132 = vector.load %arg8[%c2, %c0_33, %c0_34] : memref<5x32x32xf32, #tpu.memory_space<vmem>>, vector<1x32x32xf32>
    %133 = vector.shape_cast %132 : vector<1x32x32xf32> to vector<32x32xf32>
    %cst_35 = arith.constant dense<0.000000e+00> : vector<16x32xf32>
    %134 = tpu.matmul %1, %133, %cst_35 {dimension_numbers = #tpu.dot_dimension_numbers<[1], [0], [0], [1], [0, 0, 1, 1], [], []>} : vector<16x32xf32>, vector<32x32xf32>, vector<16x32xf32> -> vector<16x32xf32>
    %135 = vector.extract_strided_slice %3 {offsets = [11, 0], sizes = [1, 32], strides = [1, 1]} : vector<15x32xf32> to vector<1x32xf32>
    %136 = vector.broadcast %135 : vector<1x32xf32> to vector<16x32xf32>
    %137 = arith.addf %134, %136 : vector<16x32xf32>
    %c3 = arith.constant 3 : index
    %c0_36 = arith.constant 0 : index
    %c0_37 = arith.constant 0 : index
    %138 = vector.load %arg8[%c3, %c0_36, %c0_37] : memref<5x32x32xf32, #tpu.memory_space<vmem>>, vector<1x32x32xf32>
    %139 = vector.shape_cast %138 : vector<1x32x32xf32> to vector<32x32xf32>
    %cst_38 = arith.constant dense<0.000000e+00> : vector<16x32xf32>
    %140 = tpu.matmul %2, %139, %cst_38 {dimension_numbers = #tpu.dot_dimension_numbers<[1], [0], [0], [1], [0, 0, 1, 1], [], []>} : vector<16x32xf32>, vector<32x32xf32>, vector<16x32xf32> -> vector<16x32xf32>
    %141 = vector.extract_strided_slice %3 {offsets = [12, 0], sizes = [1, 32], strides = [1, 1]} : vector<15x32xf32> to vector<1x32xf32>
    %142 = vector.broadcast %141 : vector<1x32xf32> to vector<16x32xf32>
    %143 = arith.addf %140, %142 : vector<16x32xf32>
    %c0_39 = arith.constant 0 : index
    %c0_40 = arith.constant 0 : index
    %144 = vector.load %arg5[%c0_39, %c0_40] : memref<16x16xf32, #tpu.memory_space<vmem>>, vector<16x16xf32>
    %145 = vector.extract_strided_slice %131 {offsets = [0, 0], sizes = [16, 8], strides = [1, 1]} : vector<16x32xf32> to vector<16x8xf32>
    %146 = vector.extract_strided_slice %131 {offsets = [0, 8], sizes = [16, 8], strides = [1, 1]} : vector<16x32xf32> to vector<16x8xf32>
    %147 = vector.extract_strided_slice %131 {offsets = [0, 16], sizes = [16, 8], strides = [1, 1]} : vector<16x32xf32> to vector<16x8xf32>
    %148 = vector.extract_strided_slice %131 {offsets = [0, 24], sizes = [16, 8], strides = [1, 1]} : vector<16x32xf32> to vector<16x8xf32>
    %149 = vector.shape_cast %145 : vector<16x8xf32> to vector<1x16x8xf32>
    %150 = vector.shape_cast %146 : vector<16x8xf32> to vector<1x16x8xf32>
    %151 = vector.shape_cast %147 : vector<16x8xf32> to vector<1x16x8xf32>
    %152 = vector.shape_cast %148 : vector<16x8xf32> to vector<1x16x8xf32>
    %153 = tpu.concatenate %149, %150, %151, %152 in 0 : vector<1x16x8xf32>, vector<1x16x8xf32>, vector<1x16x8xf32>, vector<1x16x8xf32> -> vector<4x16x8xf32>
    %154 = vector.extract_strided_slice %137 {offsets = [0, 0], sizes = [16, 8], strides = [1, 1]} : vector<16x32xf32> to vector<16x8xf32>
    %155 = vector.extract_strided_slice %137 {offsets = [0, 8], sizes = [16, 8], strides = [1, 1]} : vector<16x32xf32> to vector<16x8xf32>
    %156 = vector.extract_strided_slice %137 {offsets = [0, 16], sizes = [16, 8], strides = [1, 1]} : vector<16x32xf32> to vector<16x8xf32>
    %157 = vector.extract_strided_slice %137 {offsets = [0, 24], sizes = [16, 8], strides = [1, 1]} : vector<16x32xf32> to vector<16x8xf32>
    %158 = vector.shape_cast %154 : vector<16x8xf32> to vector<1x16x8xf32>
    %159 = vector.shape_cast %155 : vector<16x8xf32> to vector<1x16x8xf32>
    %160 = vector.shape_cast %156 : vector<16x8xf32> to vector<1x16x8xf32>
    %161 = vector.shape_cast %157 : vector<16x8xf32> to vector<1x16x8xf32>
    %162 = tpu.concatenate %158, %159, %160, %161 in 0 : vector<1x16x8xf32>, vector<1x16x8xf32>, vector<1x16x8xf32>, vector<1x16x8xf32> -> vector<4x16x8xf32>
    %163 = vector.extract_strided_slice %143 {offsets = [0, 0], sizes = [16, 8], strides = [1, 1]} : vector<16x32xf32> to vector<16x8xf32>
    %164 = vector.extract_strided_slice %143 {offsets = [0, 8], sizes = [16, 8], strides = [1, 1]} : vector<16x32xf32> to vector<16x8xf32>
    %165 = vector.extract_strided_slice %143 {offsets = [0, 16], sizes = [16, 8], strides = [1, 1]} : vector<16x32xf32> to vector<16x8xf32>
    %166 = vector.extract_strided_slice %143 {offsets = [0, 24], sizes = [16, 8], strides = [1, 1]} : vector<16x32xf32> to vector<16x8xf32>
    %167 = vector.shape_cast %163 : vector<16x8xf32> to vector<1x16x8xf32>
    %168 = vector.shape_cast %164 : vector<16x8xf32> to vector<1x16x8xf32>
    %169 = vector.shape_cast %165 : vector<16x8xf32> to vector<1x16x8xf32>
    %170 = vector.shape_cast %166 : vector<16x8xf32> to vector<1x16x8xf32>
    %171 = tpu.concatenate %167, %168, %169, %170 in 0 : vector<1x16x8xf32>, vector<1x16x8xf32>, vector<1x16x8xf32>, vector<1x16x8xf32> -> vector<4x16x8xf32>
    "tpu.trace_start"() <{level = 10 : i32, message = "hqd,hkd->hqk"}> : () -> ()
    %cst_41 = arith.constant dense<0.000000e+00> : vector<4x16x16xf32>
    %172 = tpu.matmul %153, %162, %cst_41 {dimension_numbers = #tpu.dot_dimension_numbers<[2], [2], [1], [1], [0, 0, 0, 1, 1, 1], [0], [0]>} : vector<4x16x8xf32>, vector<4x16x8xf32>, vector<4x16x16xf32> -> vector<4x16x16xf32>
    "tpu.trace_stop"() : () -> ()
    %cst_42 = arith.constant 0.353553385 : f32
    %173 = vector.broadcast %cst_42 : f32 to vector<4x16x16xf32>
    %174 = arith.mulf %172, %173 : vector<4x16x16xf32>
    %175 = vector.shape_cast %144 : vector<16x16xf32> to vector<1x16x16xf32>
    %176 = vector.broadcast %175 : vector<1x16x16xf32> to vector<4x16x16xf32>
    %177 = arith.addf %174, %176 : vector<4x16x16xf32>
    %cst_43 = arith.constant dense<0xFF800000> : vector<4x16xf32>
    %178 = vector.multi_reduction <maximumf>, %177, %cst_43 [2] : vector<4x16x16xf32> to vector<4x16xf32>
    %179 = vector.shape_cast %178 : vector<4x16xf32> to vector<4x16x1xf32>
    %180 = vector.broadcast %179 : vector<4x16x1xf32> to vector<4x16x16xf32>
    %181 = arith.subf %177, %180 : vector<4x16x16xf32>
    %182 = math.exp %181 : vector<4x16x16xf32>
    %cst_44 = arith.constant dense<0.000000e+00> : vector<4x16xf32>
    %183 = vector.multi_reduction <add>, %182, %cst_44 [2] : vector<4x16x16xf32> to vector<4x16xf32>
    %184 = vector.shape_cast %183 : vector<4x16xf32> to vector<4x16x1xf32>
    %185 = vector.broadcast %184 : vector<4x16x1xf32> to vector<4x16x16xf32>
    %186 = arith.divf %182, %185 : vector<4x16x16xf32>
    "tpu.trace_start"() <{level = 10 : i32, message = "hqk,hkd->hqd"}> : () -> ()
    %cst_45 = arith.constant dense<0.000000e+00> : vector<4x16x8xf32>
    %187 = tpu.matmul %186, %171, %cst_45 {dimension_numbers = #tpu.dot_dimension_numbers<[2], [1], [1], [2], [0, 0, 0, 1, 1, 2], [0], [0]>} : vector<4x16x16xf32>, vector<4x16x8xf32>, vector<4x16x8xf32> -> vector<4x16x8xf32>
    "tpu.trace_stop"() : () -> ()
    %188 = vector.extract_strided_slice %187 {offsets = [0, 0, 0], sizes = [1, 16, 8], strides = [1, 1, 1]} : vector<4x16x8xf32> to vector<1x16x8xf32>
    %189 = vector.shape_cast %188 : vector<1x16x8xf32> to vector<16x8xf32>
    %190 = vector.extract_strided_slice %187 {offsets = [1, 0, 0], sizes = [1, 16, 8], strides = [1, 1, 1]} : vector<4x16x8xf32> to vector<1x16x8xf32>
    %191 = vector.shape_cast %190 : vector<1x16x8xf32> to vector<16x8xf32>
    %192 = vector.extract_strided_slice %187 {offsets = [2, 0, 0], sizes = [1, 16, 8], strides = [1, 1, 1]} : vector<4x16x8xf32> to vector<1x16x8xf32>
    %193 = vector.shape_cast %192 : vector<1x16x8xf32> to vector<16x8xf32>
    %194 = vector.extract_strided_slice %187 {offsets = [3, 0, 0], sizes = [1, 16, 8], strides = [1, 1, 1]} : vector<4x16x8xf32> to vector<1x16x8xf32>
    %195 = vector.shape_cast %194 : vector<1x16x8xf32> to vector<16x8xf32>
    %196 = tpu.concatenate %189, %191, %193, %195 in 1 : vector<16x8xf32>, vector<16x8xf32>, vector<16x8xf32>, vector<16x8xf32> -> vector<16x32xf32>
    %c4 = arith.constant 4 : index
    %c0_46 = arith.constant 0 : index
    %c0_47 = arith.constant 0 : index
    %197 = vector.load %arg8[%c4, %c0_46, %c0_47] : memref<5x32x32xf32, #tpu.memory_space<vmem>>, vector<1x32x32xf32>
    %198 = vector.shape_cast %197 : vector<1x32x32xf32> to vector<32x32xf32>
    %cst_48 = arith.constant dense<0.000000e+00> : vector<16x32xf32>
    %199 = tpu.matmul %196, %198, %cst_48 {dimension_numbers = #tpu.dot_dimension_numbers<[1], [0], [0], [1], [0, 0, 1, 1], [], []>} : vector<16x32xf32>, vector<32x32xf32>, vector<16x32xf32> -> vector<16x32xf32>
    %200 = arith.addf %101, %199 : vector<16x32xf32>
    %201 = vector.extract_strided_slice %3 {offsets = [13, 0], sizes = [1, 32], strides = [1, 1]} : vector<15x32xf32> to vector<1x32xf32>
    %202 = vector.broadcast %201 : vector<1x32xf32> to vector<16x32xf32>
    %203 = arith.addf %200, %202 : vector<16x32xf32>
    %204 = vector.extract_strided_slice %3 {offsets = [4, 0], sizes = [1, 32], strides = [1, 1]} : vector<15x32xf32> to vector<1x32xf32>
    %205 = vector.extract_strided_slice %3 {offsets = [5, 0], sizes = [1, 32], strides = [1, 1]} : vector<15x32xf32> to vector<1x32xf32>
    %cst_49 = arith.constant dense<0.000000e+00> : vector<16xf32>
    %206 = vector.multi_reduction <add>, %203, %cst_49 [1] : vector<16x32xf32> to vector<16xf32>
    %207 = vector.shape_cast %206 : vector<16xf32> to vector<16x1xf32>
    %cst_50 = arith.constant 3.200000e+01 : f32
    %208 = vector.broadcast %cst_50 : f32 to vector<16x1xf32>
    %209 = arith.divf %207, %208 : vector<16x1xf32>
    %210 = vector.broadcast %209 : vector<16x1xf32> to vector<16x32xf32>
    %211 = arith.subf %203, %210 : vector<16x32xf32>
    %212 = arith.mulf %211, %211 : vector<16x32xf32>
    %cst_51 = arith.constant dense<0.000000e+00> : vector<16xf32>
    %213 = vector.multi_reduction <add>, %212, %cst_51 [1] : vector<16x32xf32> to vector<16xf32>
    %214 = vector.shape_cast %213 : vector<16xf32> to vector<16x1xf32>
    %cst_52 = arith.constant 3.200000e+01 : f32
    %215 = vector.broadcast %cst_52 : f32 to vector<16x1xf32>
    %216 = arith.divf %214, %215 : vector<16x1xf32>
    %217 = vector.broadcast %209 : vector<16x1xf32> to vector<16x32xf32>
    %218 = arith.subf %203, %217 : vector<16x32xf32>
    %cst_53 = arith.constant 9.99999997E-7 : f32
    %219 = vector.broadcast %cst_53 : f32 to vector<16x1xf32>
    %220 = arith.addf %216, %219 : vector<16x1xf32>
    %221 = math.rsqrt %220 : vector<16x1xf32>
    %222 = vector.broadcast %221 : vector<16x1xf32> to vector<16x32xf32>
    %223 = arith.mulf %218, %222 : vector<16x32xf32>
    %224 = vector.broadcast %204 : vector<1x32xf32> to vector<16x32xf32>
    %225 = arith.mulf %223, %224 : vector<16x32xf32>
    %226 = vector.broadcast %205 : vector<1x32xf32> to vector<16x32xf32>
    %227 = arith.addf %225, %226 : vector<16x32xf32>
    %c0_54 = arith.constant 0 : index
    %c0_55 = arith.constant 0 : index
    %228 = vector.load %arg9[%c0_54, %c0_55] : memref<32x64xf32, #tpu.memory_space<vmem>>, vector<32x64xf32>
    %cst_56 = arith.constant dense<0.000000e+00> : vector<16x64xf32>
    %229 = tpu.matmul %227, %228, %cst_56 {dimension_numbers = #tpu.dot_dimension_numbers<[1], [0], [0], [1], [0, 0, 1, 1], [], []>} : vector<16x32xf32>, vector<32x64xf32>, vector<16x64xf32> -> vector<16x64xf32>
    %c0_57 = arith.constant 0 : index
    %c0_58 = arith.constant 0 : index
    %230 = vector.load %arg10[%c0_57, %c0_58] : memref<1x64xf32, #tpu.memory_space<vmem>>, vector<1x64xf32>
    %231 = vector.broadcast %230 : vector<1x64xf32> to vector<16x64xf32>
    %232 = arith.addf %229, %231 : vector<16x64xf32>
    %cst_59 = arith.constant 0.000000e+00 : f32
    %233 = vector.broadcast %cst_59 : f32 to vector<16x64xf32>
    %234 = arith.maximumf %232, %233 : vector<16x64xf32>
    %c0_60 = arith.constant 0 : index
    %c0_61 = arith.constant 0 : index
    %235 = vector.load %arg11[%c0_60, %c0_61] : memref<64x32xf32, #tpu.memory_space<vmem>>, vector<64x32xf32>
    %cst_62 = arith.constant dense<0.000000e+00> : vector<16x32xf32>
    %236 = tpu.matmul %234, %235, %cst_62 {dimension_numbers = #tpu.dot_dimension_numbers<[1], [0], [0], [1], [0, 0, 1, 1], [], []>} : vector<16x64xf32>, vector<64x32xf32>, vector<16x32xf32> -> vector<16x32xf32>
    %237 = arith.addf %203, %236 : vector<16x32xf32>
    %238 = vector.extract_strided_slice %3 {offsets = [14, 0], sizes = [1, 32], strides = [1, 1]} : vector<15x32xf32> to vector<1x32xf32>
    %239 = vector.broadcast %238 : vector<1x32xf32> to vector<16x32xf32>
    %240 = arith.addf %237, %239 : vector<16x32xf32>
    %c0_63 = arith.constant 0 : index
    %c0_64 = arith.constant 0 : index
    %241 = vector.load %arg12[%c0_63, %c0_64] : memref<16x32xf32, #tpu.memory_space<vmem>>, vector<16x32xf32>
    tpu.vector_store %arg12[%c0_63, %c0_64], %240 {strides = array<i32>} : memref<16x32xf32, #tpu.memory_space<vmem>>, vector<16x32xf32>,
    return
  }
  func.func @transform_0(%arg0: i32) -> (i32, i32) {
    %c0_i32 = arith.constant 0 : i32
    %c0_i32_0 = arith.constant 0 : i32
    %c0_i32_1 = arith.constant 0 : i32
    return %c0_i32, %c0_i32_0 : i32, i32
  }
  func.func @transform_1(%arg0: i32) -> (i32, i32) {
    %c0_i32 = arith.constant 0 : i32
    %c0_i32_0 = arith.constant 0 : i32
    %c0_i32_1 = arith.constant 0 : i32
    return %c0_i32, %c0_i32_0 : i32, i32
  }
  func.func @transform_2(%arg0: i32) -> (i32, i32) {
    %c0_i32 = arith.constant 0 : i32
    %c0_i32_0 = arith.constant 0 : i32
    %c0_i32_1 = arith.constant 0 : i32
    return %c0_i32, %c0_i32_0 : i32, i32
  }
  func.func @transform_3(%arg0: i32) -> (i32, i32) {
    %c0_i32 = arith.constant 0 : i32
    %c0_i32_0 = arith.constant 0 : i32
    %c0_i32_1 = arith.constant 0 : i32
    return %c0_i32, %c0_i32_0 : i32, i32
  }
  func.func @transform_4(%arg0: i32) -> (i32, i32) {
    %c0_i32 = arith.constant 0 : i32
    %c0_i32_0 = arith.constant 0 : i32
    %c0_i32_1 = arith.constant 0 : i32
    return %c0_i32, %c0_i32_0 : i32, i32
  }
  func.func @transform_5(%arg0: i32) -> (i32, i32) {
    %c0_i32 = arith.constant 0 : i32
    %c0_i32_0 = arith.constant 0 : i32
    %c0_i32_1 = arith.constant 0 : i32
    return %c0_i32, %c0_i32_0 : i32, i32
  }
  func.func @transform_6(%arg0: i32) -> (i32, i32) {
    %c0_i32 = arith.constant 0 : i32
    %c0_i32_0 = arith.constant 0 : i32
    %c0_i32_1 = arith.constant 0 : i32
    return %c0_i32, %c0_i32_0 : i32, i32
  }
  func.func @transform_7(%arg0: i32) -> (i32, i32, i32) {
    %c0_i32 = arith.constant 0 : i32
    %c0_i32_0 = arith.constant 0 : i32
    %c0_i32_1 = arith.constant 0 : i32
    %c0_i32_2 = arith.constant 0 : i32
    return %c0_i32, %c0_i32_0, %c0_i32_1 : i32, i32, i32
  }
  func.func @transform_8(%arg0: i32) -> (i32, i32) {
    %c0_i32 = arith.constant 0 : i32
    %c0_i32_0 = arith.constant 0 : i32
    %c0_i32_1 = arith.constant 0 : i32
    return %c0_i32, %c0_i32_0 : i32, i32
  }
  func.func @transform_9(%arg0: i32) -> (i32, i32) {
    %c0_i32 = arith.constant 0 : i32
    %c0_i32_0 = arith.constant 0 : i32
    %c0_i32_1 = arith.constant 0 : i32
    return %c0_i32, %c0_i32_0 : i32, i32
  }
  func.func @transform_10(%arg0: i32) -> (i32, i32) {
    %c0_i32 = arith.constant 0 : i32
    %c0_i32_0 = arith.constant 0 : i32
    %c0_i32_1 = arith.constant 0 : i32
    return %c0_i32, %c0_i32_0 : i32, i32
  }
  func.func @transform_11(%arg0: i32) -> (i32, i32) {
    %c0_i32 = arith.constant 0 : i32
    %c0_i32_0 = arith.constant 0 : i32
    %c0_i32_1 = arith.constant 0 : i32
    return %c0_i32, %c0_i32_0 : i32, i32
  }
}

</mosaic_0001>

<bundles_post_ra>
// kernel: decoder_block.1
= control target key start
LH: loop header
LB: loop body
LE: loop exit
PB: predicated region body
PF: predicated region fallthrough
CT: control target
= control target key end

     0   :  { %vm47_vm0 = vcmask 261120   ;;  %s2603_s0 = inlined_call_operand.vmem [shape: f32[16,32], index: 0, kind: input, shape index: {}]   ;;  %s2604_s1 = inlined_call_operand.vmem [shape: f32[16,32], index: 1, kind: input, shape index: {}]   ;;  %s2605_s2 = inlined_call_operand.vmem [shape: f32[16,32], index: 2, kind: input, shape index: {}]   ;;  %s2606_s3 = inlined_call_operand.vmem [shape: f32[16,16], index: 3, kind: input, shape index: {}]   ;;  %s2607_s4 = inlined_call_operand.vmem [shape: f32[16,16], index: 4, kind: input, shape index: {}]   ;;  %s2608_s5 = inlined_call_operand.vmem [shape: f32[15,32], index: 5, kind: input, shape index: {}]   ;;  %s2609_s6 = inlined_call_operand.vmem [shape: f32[32,96], index: 6, kind: input, shape index: {}]   ;;  %s2610_s7 = inlined_call_operand.vmem [shape: f32[5,32,32], index: 7, kind: input, shape index: {}]   ;;  %s2611_s8 = inlined_call_operand.vmem [shape: f32[32,64], index: 8, kind: input, shape index: {}]   ;;  %s2612_s9 = inlined_call_operand.vmem [shape: f32[1,64], index: 9, kind: input, shape index: {}]   ;;  %s2613_s10 = inlined_call_operand.vmem [shape: f32[64,32], index: 10, kind: input, shape index: {}]   ;;  %s2614_s11 = inlined_call_operand.hbm [shape: f32[16,32], index: 11, kind: output, shape index: {}]  }
   0x1   :  { %v1956_v0 = vld [vmem:[%s2603_s0] sm:$0xff] }
   0x2   :  { %v48_v1 = vsel %vm47_vm0, %v1956_v0, 0.0 }
   0x3   :  { %16 = vsyncpa [#allocation3], 0  ;;  %49 = vadd.xlane.f32.xlu0 %v48_v1  ;;  %v1963_v2 = vld [vmem:[%s2603_s0 + $0x8] sm:$0xff]  ;;  %v1881_v4 = vmov 32.0   ;;  %v108_v21 = vld [vmem:[%s2609_s6 + $0x18] sm:$0xff]  ;;  %s1882_s30 = smov 32  }
   0x4   :  { %v51_v3 = vsel %vm47_vm0, %v1963_v2, 0.0  ;;  %1775 = vrcp.f32 %v1881_v4  ;;  %127 = vmatpush.msra.mxu0 %v108_v21  ;;  %v107_v22 = vld [vmem:[%s2609_s6 + $0x10] sm:$0xff]  ;;  %v106_v23 = vld [vmem:[%s2609_s6 + $0x8] sm:$0xff]  ;;  %v105_v24 = vld [vmem:[%s2609_s6] sm:$0xff]  ;;  %s1883_s6 = smov 120   ;;  %s1884_s12 = smov 112  }
   0x5   :  { %v1991_v28 = vld [vmem:[%s2608_s5] sm:$0xff]  ;;  %s1885_s13 = smov 104   ;;  %s1886_s14 = smov 96   ;;  %vm203_vm8 = vcmask 64512   ;;  %vm356_vm9 = vcmask 130048  }
   0x6   :  { %128 = vmatpush.msra.mxu0 %v107_v22  ;;  %v141_v29 = vperm.slane %v1991_v28, 7  ;;  %v99_v41 = vperm.slane %v1991_v28, 0  ;;  %v102_v45 = vperm.slane %v1991_v28, 1  ;;  %v138_v1 = vperm.slane %v1991_v28, 6  ;;  %s1887_s17 = smov 64   ;;  %s1889_s21 = smov 8  }
   0x7   :  { %s1890_s22 = smov 16   ;;  %s1620_s0 = sshll.u32 %s2614_s11, 4  ;;  %s1621_s0 = int_to_ptr.hbm [resolvable:$true] %s1620_s0 }
   0x8   :  { %129 = vmatpush.msra.mxu0 %v106_v23  ;;  %143 = vrot.lane.b32.xlu2 %v141_v29, %s1882_s30  ;;  %s1892_s23 = smov 128  }
   0xa   :  { %v1776_v5 = vpop.eup %1775  ;;  %130 = vmatpush.msra.mxu0 %v105_v24 }
   0xb   :  { %52 = vadd.xlane.f32.xlu0 %v51_v3  ;;  %v55_v6 = vmul.f32 32.0, %v1776_v5  ;;  %vm59_vm1 = vweird.f32 %v1776_v5 }
   0xd   :  { %v56_v7 = vsub.f32 1.0, %v55_v6 }
   0xf   :  { %v57_v8 = vmul.f32 %v1776_v5, %v56_v7  ;;  %v2022_v7 = vld [vmem:[%s2608_s5 + $0x8] sm:$0x7f] }
  0x11   :  { %v58_v9 = vadd.f32 %v1776_v5, %v57_v8  ;;  %v148_v8 = vperm.slane %v2022_v7, 0 }
  0x13   :  { %v1967_v10 = vsel %vm59_vm1, %v1776_v5, %v58_v9 }
  0x62   :  { %v144_v55 = vpop.permute.xlu2 %143 }
  0x76   :  { %v50_v11 = vpop.xlane.xlu0 %49 }
  0x77   :  { %v61_v12 = vmul.f32 %v1967_v10, %v50_v11 }
  0x79   :  { %v63_v13 = vsub.f32 %v1956_v0, %v61_v12 }
  0x7b   :  { %v65_v14 = vmul.f32 %v63_v13, %v63_v13 }
  0x7d   :  { %v67_v15 = vsel %vm47_vm0, %v65_v14, 0.0 }
  0x7e   :  { %68 = vadd.xlane.f32.xlu1 %v67_v15  ;;  %v53_v16 = vpop.xlane.xlu0 %52 }
  0x7f   :  { %v62_v17 = vmul.f32 %v1967_v10, %v53_v16 }
  0x81   :  { %v64_v18 = vsub.f32 %v1963_v2, %v62_v17 }
  0x83   :  { %v66_v19 = vmul.f32 %v64_v18, %v64_v18 }
  0x85   :  { %v70_v20 = vsel %vm47_vm0, %v66_v19, 0.0 }
  0x86   :  { %71 = vadd.xlane.f32.xlu1 %v70_v20 }
  0xf1   :  { %v69_v25 = vpop.xlane.xlu1 %68 }
  0xf2   :  { %v73_v26 = vmul.f32 %v69_v25, %v1967_v10 }
  0xf4   :  { %v75_v27 = vadd.f32 1e-06, %v73_v26 }
  0xf6   :  { %1777 = vrsqrt.f32 %v75_v27  ;;  %vm83_vm3 = vweird.f32 %v75_v27 }
  0xf9   :  { %v72_v30 = vpop.xlane.xlu1 %71 }
  0xfa   :  { %v74_v31 = vmul.f32 %v72_v30, %v1967_v10 }
  0xfc   :  { %v1778_v32 = vpop.eup %1777  ;;  %v76_v33 = vadd.f32 1e-06, %v74_v31 }
  0xfd   :  { %v78_v34 = vmul.f32 %v1778_v32, %v75_v27  ;;  %vm84_vm2 = vweird.f32 %v1778_v32 }
  0xfe   :  { %1779 = vrsqrt.f32 %v76_v33  ;;  %vm85_vm4 = vmor %vm83_vm3, %vm84_vm2  ;;  %vm93_vm6 = vweird.f32 %v76_v33 }
  0xff   :  { %v79_v35 = vmul.f32 %v1778_v32, %v78_v34 }
 0x101   :  { %v80_v36 = vmul.f32 0.5, %v79_v35 }
 0x103   :  { %v81_v37 = vsub.f32 1.5, %v80_v36 }
 0x104   :  { %v1780_v38 = vpop.eup %1779 }
 0x105   :  { %v82_v39 = vmul.f32 %v1778_v32, %v81_v37  ;;  %v88_v40 = vmul.f32 %v1780_v38, %v76_v33  ;;  %vm94_vm5 = vweird.f32 %v1780_v38 }
 0x106   :  { %vm95_vm7 = vmor %vm93_vm6, %vm94_vm5 }
 0x107   :  { %v86_v42 = vsel %vm85_vm4, %v1778_v32, %v82_v39  ;;  %v89_v43 = vmul.f32 %v1780_v38, %v88_v40  ;;  %v155_v32 = vld [vmem:[%s2606_s3] sm:$0xff] }
 0x108   :  { %v97_v44 = vmul.f32 %v86_v42, %v63_v13 }
 0x109   :  { %v90_v46 = vmul.f32 0.5, %v89_v43 }
 0x10a   :  { %v100_v47 = vmul.f32 %v99_v41, %v97_v44 }
 0x10b   :  { %v91_v48 = vsub.f32 1.5, %v90_v46 }
 0x10c   :  { %v103_v49 = vadd.f32 %v102_v45, %v100_v47 }
 0x10d   :  { %v92_v50 = vmul.f32 %v1780_v38, %v91_v48 }
 0x10e   :  { %1632 = vmatmul.msk.f32.vlgmr.msra.gmra.mxu0 %vm47_vm0, %v103_v49 }
 0x10f   :  { %v96_v51 = vsel %vm95_vm7, %v1780_v38, %v92_v50 }
 0x110   :  { %v98_v52 = vmul.f32 %v96_v51, %v64_v18 }
 0x112   :  { %v101_v53 = vmul.f32 %v99_v41, %v98_v52 }
 0x114   :  { %v104_v54 = vadd.f32 %v102_v45, %v101_v53  ;;  %v156_v45 = vld [vmem:[%s2606_s3 + $0x8] sm:$0xff]  ;;  %s1888_s3 = smov 24  }
 0x116   :  { %1633 = vmatmul.msk.f32.gmra.mxu0 %vm47_vm0, %v104_v54 }
 0x18b   :  { %v1999_v56 = vpop.f32.mrf.mxu0 }
 0x18c   :  { %v146_v57 = vadd.f32 %v144_v55, %v1999_v56  ;;  %v139_v3 = vadd.f32 %v138_v1, %v1999_v56 }
 0x18e   :  { %173 = vrot.lane.b32.xlu1 %v146_v57, %s1883_s6 }
 0x193   :  { %v2003_v58 = vpop.f32.mrf.mxu0 }
 0x194   :  { %v147_v59 = vadd.f32 %v144_v55, %v2003_v58  ;;  %v140_v6 = vadd.f32 %v138_v1, %v2003_v58 }
 0x196   :  { %179 = vrot.lane.b32.xlu0 %v147_v59, %s1884_s12  ;;  %175 = vrot.lane.b32.xlu2 %v147_v59, %s1883_s6 }
 0x19e   :  { %177 = vrot.lane.b32.xlu2 %v146_v57, %s1884_s12 }
 0x1a6   :  { %183 = vrot.lane.b32.xlu2 %v147_v59, %s1885_s13 }
 0x1ae   :  { %181 = vrot.lane.b32.xlu2 %v146_v57, %s1885_s13 }
 0x1f0   :  { %v176_v60 = vpop.permute.xlu2 %175 }
 0x1f1   :  { %237 = vrot.lane.b32.xlu0 %v176_v60, %s1886_s14 }
 0x1f8   :  { %v178_v61 = vpop.permute.xlu2 %177 }
 0x1f9   :  { %270 = vrot.lane.b32.xlu0 %v178_v61, %s1886_s14 }
 0x200   :  { %v184_v62 = vpop.permute.xlu2 %183  ;;  %v174_v63 = vpop.permute.xlu1 %173 }
 0x201   :  { %307 = vrot.lane.b32.xlu0 %v184_v62, %s1886_s14  ;;  %235 = vrot.lane.b32.xlu1 %v174_v63, %s1886_s14 }
 0x208   :  { %v180_v4 = vpop.permute.xlu0 %179  ;;  %v182_v5 = vpop.permute.xlu2 %181 }
 0x209   :  { %272 = vrot.lane.b32.xlu2 %v180_v4, %s1886_s14  ;;  %305 = vrot.lane.b32.xlu0 %v182_v5, %s1886_s14 }
 0x20a   :  { %163 = vrot.lane.b32.xlu1 %v139_v3, %s1884_s12 }
 0x211   :  { %159 = vrot.lane.b32.xlu2 %v139_v3, %s1883_s6  ;;  %201 = vrot.lane.b32.xlu0 %v147_v59, %s1886_s14 }
 0x212   :  { %165 = vrot.lane.b32.xlu1 %v140_v6, %s1884_s12 }
 0x219   :  { %161 = vrot.lane.b32.xlu2 %v140_v6, %s1883_s6 }
 0x21a   :  { %169 = vrot.lane.b32.xlu1 %v140_v6, %s1885_s13 }
 0x221   :  { %167 = vrot.lane.b32.xlu2 %v139_v3, %s1885_s13 }
 0x222   :  { %150 = vrot.lane.b32.xlu1 %v148_v8, %s1887_s17 }
 0x229   :  { %199 = vrot.lane.b32.xlu2 %v146_v57, %s1886_s14 }
 0x263   :  { %v238_v9 = vpop.permute.xlu0 %237  ;;  %v273_v11 = vpop.permute.xlu2 %272 }
 0x264   :  { %1638 = vmatpush.xpose.msk.msra.mxu2 %vm203_vm8, %v238_v9  ;;  %1642 = vmatpush.xpose.msk.msra.mxu3 %vm203_vm8, %v273_v11 }
 0x26b   :  { %v271_v12 = vpop.permute.xlu0 %270  ;;  %v160_v13 = vpop.permute.xlu2 %159 }
 0x26c   :  { %1643 = vmatpush.xpose.msk.msra.mxu3 %vm203_vm8, %v271_v12 }
 0x273   :  { %v308_v14 = vpop.permute.xlu0 %307  ;;  %v162_v15 = vpop.permute.xlu2 %161 }
 0x274   :  { %v236_v16 = vpop.permute.xlu1 %235  ;;  %1646 = vmatpush.xpose.msk.msrb.mxu0 %vm203_vm8, %v308_v14 }
 0x275   :  { %1639 = vmatpush.xpose.msk.msra.mxu2 %vm203_vm8, %v236_v16 }
 0x278   :  { %1640 = vmatmul.msk.f32.vlgmr.msra.gmra.mxu2 %vm203_vm8, %v160_v13 }
 0x27b   :  { %v306_v17 = vpop.permute.xlu0 %305  ;;  %v168_v19 = vpop.permute.xlu2 %167 }
 0x27c   :  { %v164_v18 = vpop.permute.xlu1 %163  ;;  %1647 = vmatpush.xpose.msk.msrb.mxu0 %vm203_vm8, %v306_v17 }
 0x27d   :  { %1644 = vmatmul.msk.f32.vlgmr.msra.gmra.mxu3 %vm203_vm8, %v164_v18 }
 0x27f   :  { %1648 = vmatmul.msk.f32.vlgmr.msrb.gmra.mxu0 %vm203_vm8, %v168_v19 }
 0x280   :  { %1641 = vmatmul.msk.f32.gmra.mxu2 %vm203_vm8, %v162_v15 }
 0x283   :  { %v202_v20 = vpop.permute.xlu0 %201  ;;  %v200_v22 = vpop.permute.xlu2 %199 }
 0x284   :  { %v166_v21 = vpop.permute.xlu1 %165  ;;  %1634 = vmatpush.xpose.msk.msra.mxu1 %vm203_vm8, %v202_v20 }
 0x285   :  { %1645 = vmatmul.msk.f32.gmra.mxu3 %vm203_vm8, %v166_v21 }
 0x288   :  { %1635 = vmatpush.xpose.msk.msra.mxu1 %vm203_vm8, %v200_v22 }
 0x28b   :  { %1636 = vmatmul.msk.f32.vlgmr.msra.gmra.mxu1 %vm203_vm8, %v139_v3 }
 0x28c   :  { %v170_v23 = vpop.permute.xlu1 %169 }
 0x28d   :  { %1649 = vmatmul.msk.f32.gmra.mxu0 %vm203_vm8, %v170_v23 }
 0x293   :  { %1637 = vmatmul.msk.f32.gmra.mxu1 %vm203_vm8, %v140_v6 }
 0x294   :  { %v151_v24 = vpop.permute.xlu1 %150 }
 0x295   :  { %v153_v25 = vadd.f32 %v151_v24, %v1999_v56  ;;  %v154_v26 = vadd.f32 %v151_v24, %v2003_v58 }
 0x297   :  { %v2045_v27 = vpack.i.bf16 %v153_v25, %v154_v26 }
 0x2fb   :  { %v264_v31 = vpop.f32.mrf.mxu2 }
 0x2fc   :  { %v334_v29 = vpop.f32.mrf.mxu0  ;;  %v342_v35 = vmul.f32 0.35355338, %v264_v31 }
 0x2fd   :  { %v346_v30 = vmul.f32 0.35355338, %v334_v29 }
 0x2fe   :  { %v350_v40 = vadd.f32 %v342_v35, %v155_v32 }
 0x2ff   :  { %v354_v33 = vadd.f32 %v346_v30, %v155_v32 }
 0x300   :  { %v299_v34 = vpop.f32.mrf.mxu3  ;;  %v363_v43 = vsel %vm356_vm9, %v350_v40, -inf }
 0x301   :  { %v344_v36 = vmul.f32 0.35355338, %v299_v34  ;;  %v375_v37 = vsel %vm356_vm9, %v354_v33, -inf }
 0x302   :  { %376 = vmax.xlane.f32.xlu0 %v375_v37 }
 0x303   :  { %v352_v38 = vadd.f32 %v344_v36, %v155_v32  ;;  %v267_v48 = vpop.f32.mrf.mxu2 }
 0x304   :  { %v343_v51 = vmul.f32 0.35355338, %v267_v48 }
 0x305   :  { %v369_v39 = vsel %vm356_vm9, %v352_v38, -inf }
 0x306   :  { %370 = vmax.xlane.f32.xlu2 %v369_v39  ;;  %v351_v53 = vadd.f32 %v343_v51, %v156_v45 }
 0x308   :  { %v302_v41 = vpop.f32.mrf.mxu3  ;;  %v366_v54 = vsel %vm356_vm9, %v351_v53, -inf  ;;  %v229_v55 = vpop.f32.mrf.mxu1 }
 0x309   :  { %v345_v42 = vmul.f32 0.35355338, %v302_v41  ;;  %v340_v56 = vmul.f32 0.35355338, %v229_v55 }
 0x30a   :  { %v337_v44 = vpop.f32.mrf.mxu0  ;;  %364 = vmax.xlane.f32.xlu0 %v363_v43 }
 0x30b   :  { %v347_v46 = vmul.f32 0.35355338, %v337_v44  ;;  %v353_v47 = vadd.f32 %v345_v42, %v156_v45  ;;  %v2065_v57 = vadd.f32 %v340_v56, %v155_v32 }
 0x30d   :  { %v372_v49 = vsel %vm356_vm9, %v353_v47, -inf  ;;  %v355_v50 = vadd.f32 %v347_v46, %v156_v45  ;;  %v357_v58 = vsel %vm356_vm9, %v2065_v57, -inf }
 0x30e   :  { %373 = vmax.xlane.f32.xlu2 %v372_v49 }
 0x30f   :  { %v378_v52 = vsel %vm356_vm9, %v355_v50, -inf }
 0x310   :  { %379 = vmax.xlane.f32.xlu1 %v378_v52  ;;  %v232_v59 = vpop.f32.mrf.mxu1 }
 0x311   :  { %v341_v60 = vmul.f32 0.35355338, %v232_v59 }
 0x313   :  { %v2069_v61 = vadd.f32 %v341_v60, %v156_v45 }
 0x315   :  { %v360_v62 = vsel %vm356_vm9, %v2069_v61, -inf }
 0x318   :  { %367 = vmax.xlane.f32.xlu1 %v366_v54 }
 0x31e   :  { %1725 = vrot.lane.b32.xlu0 %v2045_v27, %s1883_s6 }
 0x326   :  { %1730 = vrot.lane.b32.xlu2 %v2045_v27, %s1884_s12 }
 0x331   :  { %1735 = vrot.lane.b32.xlu1 %v2045_v27, %s1885_s13 }
 0x348   :  { %358 = vmax.xlane.f32.xlu0 %v357_v58 }
 0x35b   :  { %361 = vmax.xlane.f32.xlu1 %v360_v62 }
 0x375   :  { %v377_v63 = vpop.xlane.xlu0 %376 }
 0x376   :  { %v387_v1 = vsub.f32 %v354_v33, %v377_v63 }
 0x378   :  { %v401_v3 = vmul.f32 1.442695, %v387_v1 }
 0x379   :  { %v371_v4 = vpop.xlane.xlu2 %370 }
 0x37a   :  { %1781 = vpow2.f32 %v401_v3  ;;  %v385_v5 = vsub.f32 %v352_v38, %v371_v4 }
 0x37c   :  { %v397_v6 = vmul.f32 1.442695, %v385_v5 }
 0x37d   :  { %v365_v8 = vpop.xlane.xlu0 %364 }
 0x37e   :  { %v383_v9 = vsub.f32 %v350_v40, %v365_v8  ;;  %1783 = vpow2.f32 %v397_v6 }
 0x380   :  { %v2073_v11 = vpop.eup %1781  ;;  %v393_v12 = vmul.f32 1.442695, %v383_v9 }
 0x381   :  { %v374_v13 = vpop.xlane.xlu2 %373  ;;  %v423_v14 = vsel %vm356_vm9, %v2073_v11, 0.0 }
 0x382   :  { %1785 = vpow2.f32 %v393_v12  ;;  %v386_v15 = vsub.f32 %v353_v47, %v374_v13  ;;  %424 = vadd.xlane.f32.xlu0 %v423_v14 }
 0x383   :  { %v380_v16 = vpop.xlane.xlu1 %379 }
 0x384   :  { %v399_v17 = vmul.f32 1.442695, %v386_v15  ;;  %v388_v18 = vsub.f32 %v355_v50, %v380_v16  ;;  %v2077_v19 = vpop.eup %1783 }
 0x385   :  { %v417_v23 = vsel %vm356_vm9, %v2077_v19, 0.0 }
 0x386   :  { %1787 = vpow2.f32 %v399_v17  ;;  %v403_v20 = vmul.f32 1.442695, %v388_v18 }
 0x388   :  { %v2079_v21 = vpop.eup %1785  ;;  %1789 = vpow2.f32 %v403_v20 }
 0x389   :  { %v411_v22 = vsel %vm356_vm9, %v2079_v21, 0.0  ;;  %v1731_v35 = vpop.permute.xlu2 %1730 }
 0x38a   :  { %412 = vadd.xlane.f32.xlu2 %v411_v22  ;;  %418 = vadd.xlane.f32.xlu0 %v417_v23  ;;  %v1732_v38 = vunpack.i.l.bf16 %v1731_v35  ;;  %v1733_v41 = vunpack.i.h.bf16 %v1731_v35 }
 0x38b   :  { %v368_v24 = vpop.xlane.xlu1 %367 }
 0x38c   :  { %v2085_v25 = vpop.eup %1787  ;;  %v384_v26 = vsub.f32 %v351_v53, %v368_v24 }
 0x38d   :  { %v420_v29 = vsel %vm356_vm9, %v2085_v25, 0.0 }
 0x38e   :  { %v2089_v30 = vpop.eup %1789  ;;  %v395_v31 = vmul.f32 1.442695, %v384_v26  ;;  %421 = vadd.xlane.f32.xlu1 %v420_v29 }
 0x38f   :  { %v426_v32 = vsel %vm356_vm9, %v2089_v30, 0.0 }
 0x390   :  { %1791 = vpow2.f32 %v395_v31  ;;  %v1726_v33 = vpop.permute.xlu0 %1725 }
 0x391   :  { %v1727_v36 = vunpack.i.l.bf16 %v1726_v33  ;;  %v1728_v40 = vunpack.i.h.bf16 %v1726_v33 }
 0x392   :  { %427 = vadd.xlane.f32.xlu2 %v426_v32 }
 0x393   :  { %v1739_v39 = vpack.i.bf16 %v1732_v38, %v1727_v36  ;;  %v1744_v42 = vpack.i.bf16 %v1733_v41, %v1728_v40 }
 0x396   :  { %v2093_v34 = vpop.eup %1791 }
 0x397   :  { %v414_v37 = vsel %vm356_vm9, %v2093_v34, 0.0 }
 0x39a   :  { %415 = vadd.xlane.f32.xlu2 %v414_v37 }
 0x39e   :  { %1740 = vrot.lane.b32.xlu0 %v1739_v39, %s1887_s17 }
 0x3a3   :  { %v1736_v43 = vpop.permute.xlu1 %1735 }
 0x3a7   :  { %1745 = vrot.lane.b32.xlu1 %v1744_v42, %s1887_s17 }
 0x3b2   :  { %1750 = vrot.lane.b32.xlu2 %v1736_v43, %s1887_s17 }
 0x3ba   :  { %1755 = vrot.lane.b32.xlu2 %v2045_v27, %s1887_s17 }
 0x3bb   :  { %v359_v44 = vpop.xlane.xlu0 %358 }
 0x3bc   :  { %v381_v45 = vsub.f32 %v2065_v57, %v359_v44 }
 0x3be   :  { %v389_v46 = vmul.f32 1.442695, %v381_v45 }
 0x3c0   :  { %1793 = vpow2.f32 %v389_v46 }
 0x3c6   :  { %v2103_v47 = vpop.eup %1793 }
 0x3c7   :  { %v405_v48 = vsel %vm356_vm9, %v2103_v47, 0.0 }
 0x3c8   :  { %406 = vadd.xlane.f32.xlu0 %v405_v48 }
 0x3ce   :  { %v362_v49 = vpop.xlane.xlu1 %361 }
 0x3cf   :  { %v382_v50 = vsub.f32 %v2069_v61, %v362_v49 }
 0x3d1   :  { %v391_v51 = vmul.f32 1.442695, %v382_v50 }
 0x3d3   :  { %1795 = vpow2.f32 %v391_v51 }
 0x3d9   :  { %v2108_v52 = vpop.eup %1795 }
 0x3da   :  { %v408_v27 = vsel %vm356_vm9, %v2108_v52, 0.0 }
 0x3db   :  { %409 = vadd.xlane.f32.xlu1 %v408_v27 }
 0x3f5   :  { %v425_v53 = vpop.xlane.xlu0 %424 }
 0x3f6   :  { %1797 = vrcp.f32 %v425_v53  ;;  %v530_v8 = vand.u32 2147483648, %v425_v53  ;;  %vm524_vm11 = vweird.f32 %v425_v53  ;;  %v528_v18 = vand.u32 2147483647, %v425_v53 }
 0x3f8   :  { %v531_v20 = vor.u32 1.1754944e-38, %v530_v8  ;;  %vm529_vm15 = vcmp.eq.f32.partialorder %v528_v18, 8.507059e+37 }
 0x3fc   :  { %v1798_v54 = vpop.eup %1797 }
 0x3fd   :  { %v413_v55 = vpop.xlane.xlu2 %412  ;;  %v419_v56 = vpop.xlane.xlu0 %418  ;;  %v520_v57 = vmul.f32 %v1798_v54, %v425_v53  ;;  %vm525_vm10 = vweird.f32 %v1798_v54 }
 0x3fe   :  { %1799 = vrcp.f32 %v413_v55  ;;  %v468_v22 = vand.u32 2147483647, %v413_v55  ;;  %vm2137_vm12 = vmor %vm524_vm11, %vm525_vm10  ;;  %v470_v24 = vand.u32 2147483648, %v413_v55  ;;  %v498_v26 = vand.u32 2147483647, %v419_v56 }
 0x3ff   :  { %1801 = vrcp.f32 %v419_v56  ;;  %v521_v60 = vsub.f32 1.0, %v520_v57  ;;  %v500_v29 = vand.u32 2147483648, %v419_v56  ;;  %vm464_vm1 = vweird.f32 %v413_v55 }
 0x400   :  { %vm2147_vm2 = vcmp.eq.f32.partialorder %v468_v22, 8.507059e+37  ;;  %vm494_vm3 = vweird.f32 %v419_v56  ;;  %v471_v43 = vor.u32 1.1754944e-38, %v470_v24  ;;  %vm2155_vm5 = vcmp.eq.f32.partialorder %v498_v26, 8.507059e+37 }
 0x401   :  { %v2112_v58 = vpop.xlane.xlu1 %421  ;;  %v522_v3 = vmul.f32 %v1798_v54, %v521_v60  ;;  %v501_v49 = vor.u32 1.1754944e-38, %v500_v29 }
 0x402   :  { %1803 = vrcp.f32 %v2112_v58  ;;  %vm509_vm7 = vweird.f32 %v2112_v58  ;;  %v515_v50 = vand.u32 2147483648, %v2112_v58 }
 0x403   :  { %v523_v12 = vadd.f32 %v1798_v54, %v522_v3 }
 0x404   :  { %v2114_v59 = vpop.eup %1799  ;;  %v516_v29 = vor.u32 1.1754944e-38, %v515_v50 }
 0x405   :  { %v2117_v61 = vpop.eup %1801  ;;  %v460_v62 = vmul.f32 %v2114_v59, %v413_v55  ;;  %v2120_v63 = vpop.xlane.xlu2 %427  ;;  %v527_v32 = vsel %vm2137_vm12, %v1798_v54, %v523_v12  ;;  %vm465_vm13 = vweird.f32 %v2114_v59 }
 0x406   :  { %v490_v1 = vmul.f32 %v2117_v61, %v419_v56  ;;  %1805 = vrcp.f32 %v2120_v63  ;;  %vm495_vm14 = vweird.f32 %v2117_v61  ;;  %v532_v41 = vsel %vm529_vm15, %v531_v20, %v527_v32  ;;  %vm2151_vm4 = vmor %vm464_vm1, %vm465_vm13 }
 0x407   :  { %v461_v4 = vsub.f32 1.0, %v460_v62  ;;  %vm2162_vm6 = vmor %vm494_vm3, %vm495_vm14  ;;  %v513_v56 = vand.u32 2147483647, %v2112_v58  ;;  %vm539_vm10 = vweird.f32 %v2120_v63  ;;  %v545_v57 = vand.u32 2147483648, %v2120_v63 }
 0x408   :  { %v491_v5 = vsub.f32 1.0, %v490_v1  ;;  %v2124_v6 = vpop.eup %1803  ;;  %v533_v62 = vmul.f32 %v2073_v11, %v532_v41 }
 0x409   :  { %v462_v13 = vmul.f32 %v2114_v59, %v461_v4  ;;  %v505_v15 = vmul.f32 %v2124_v6, %v2112_v58  ;;  %vm510_vm12 = vweird.f32 %v2124_v6 }
 0x40a   :  { %v492_v14 = vmul.f32 %v2117_v61, %v491_v5  ;;  %v543_v5 = vand.u32 2147483647, %v2120_v63  ;;  %vm2210_vm1 = vmor %vm509_vm7, %vm510_vm12 }
 0x40b   :  { %v463_v33 = vadd.f32 %v2114_v59, %v462_v13  ;;  %v506_v37 = vsub.f32 1.0, %v505_v15 }
 0x40c   :  { %v2126_v9 = vpop.eup %1805  ;;  %v493_v36 = vadd.f32 %v2117_v61, %v492_v14  ;;  %vm544_vm3 = vcmp.eq.f32.partialorder %v543_v5, 8.507059e+37  ;;  %v723_v5 = vld [vmem:[%s2610_s7 + $0x18] sm:$0xff] }
 0x40d   :  { %v535_v16 = vmul.f32 %v2126_v9, %v2120_v63  ;;  %v2134_v17 = vpop.xlane.xlu2 %415  ;;  %v467_v51 = vsel %vm2151_vm4, %v2114_v59, %v463_v33  ;;  %v507_v27 = vmul.f32 %v2124_v6, %v506_v37  ;;  %vm540_vm11 = vweird.f32 %v2126_v9 }
 0x40e   :  { %1807 = vrcp.f32 %v2134_v17  ;;  %v497_v55 = vsel %vm2162_vm6, %v2117_v61, %v493_v36  ;;  %v472_v59 = vsel %vm2147_vm2, %v471_v43, %v467_v51  ;;  %vm479_vm13 = vweird.f32 %v2134_v17  ;;  %vm2196_vm15 = vmor %vm539_vm10, %vm540_vm11 }
 0x40f   :  { %v536_v31 = vsub.f32 1.0, %v535_v16  ;;  %v502_v61 = vsel %vm2155_vm5, %v501_v49, %v497_v55  ;;  %v508_v12 = vadd.f32 %v2124_v6, %v507_v27  ;;  %v485_v13 = vand.u32 2147483648, %v2134_v17 }
 0x410   :  { %v1741_v35 = vpop.permute.xlu0 %1740  ;;  %v473_v16 = vmul.f32 %v2079_v21, %v472_v59  ;;  %v503_v20 = vmul.f32 %v2077_v19, %v502_v61  ;;  %v483_v24 = vand.u32 2147483647, %v2134_v17  ;;  %v546_v63 = vor.u32 1.1754944e-38, %v545_v57 }
 0x411   :  { %v1742_v38 = vunpack.i.l.bf16 %v1741_v35  ;;  %v1743_v39 = vunpack.i.h.bf16 %v1741_v35  ;;  %v537_v45 = vmul.f32 %v2126_v9, %v536_v31  ;;  %v512_v26 = vsel %vm2210_vm1, %v2124_v6, %v508_v12  ;;  %v720_v12 = vld [vmem:[%s2610_s7] sm:$0xff] }
 0x412   :  { %v486_v31 = vor.u32 1.1754944e-38, %v485_v13  ;;  %vm484_vm4 = vcmp.eq.f32.partialorder %v483_v24, 8.507059e+37  ;;  %vm514_vm5 = vcmp.eq.f32.partialorder %v513_v56, 8.507059e+37  ;;  %vm717_vm1 = vcmask 195584  }
 0x413   :  { %610 = vmatpush.msrb.mxu2 %v1742_v38  ;;  %645 = vmatpush.msrb.mxu3 %v1743_v39  ;;  %v538_v3 = vadd.f32 %v2126_v9, %v537_v45  ;;  %v517_v36 = vsel %vm514_vm5, %v516_v29, %v512_v26  ;;  %v755_v26 = vperm.slane %v2022_v7, 1 }
 0x414   :  { %v1808_v46 = vpop.eup %1807  ;;  %v518_v39 = vmul.f32 %v2085_v25, %v517_v36 }
 0x415   :  { %v475_v53 = vmul.f32 %v1808_v46, %v2134_v17  ;;  %v1751_v54 = vpop.permute.xlu2 %1750  ;;  %vm480_vm14 = vweird.f32 %v1808_v46  ;;  %v542_v22 = vsel %vm2196_vm15, %v2126_v9, %v538_v3 }
 0x416   :  { %v1752_v60 = vunpack.i.l.bf16 %v1751_v54  ;;  %v1753_v4 = vunpack.i.h.bf16 %v1751_v54  ;;  %vm2217_vm2 = vmor %vm479_vm13, %vm480_vm14  ;;  %v547_v32 = vsel %vm544_vm3, %v546_v63, %v542_v22 }
 0x417   :  { %v476_v1 = vsub.f32 1.0, %v475_v53  ;;  %v548_v37 = vmul.f32 %v2089_v30, %v547_v32 }
 0x418   :  { %680 = vmatpush.msra.mxu0 %v1752_v60 }
 0x419   :  { %v477_v8 = vmul.f32 %v1808_v46, %v476_v1  ;;  %v1746_v11 = vpop.permute.xlu1 %1745 }
 0x41a   :  { %681 = vmatpush.msra.mxu0 %v1753_v4  ;;  %v1747_v14 = vunpack.i.l.bf16 %v1746_v11  ;;  %v1748_v15 = vunpack.i.h.bf16 %v1746_v11  ;;  %v721_v11 = vld [vmem:[%s2610_s7 + $0x8] sm:$0xff] }
 0x41b   :  { %1656 = vmatmul.msk.f32.vlgmr.msra.gmra.mxu0 %vm356_vm9, %v533_v62  ;;  %v478_v23 = vadd.f32 %v1808_v46, %v477_v8  ;;  %v722_v8 = vld [vmem:[%s2610_s7 + $0x10] sm:$0xff] }
 0x41c   :  { %611 = vmatpush.msrb.mxu2 %v1747_v14  ;;  %646 = vmatpush.msrb.mxu3 %v1748_v15 }
 0x41d   :  { %1652 = vmatmul.msk.f32.vlgmr.msrb.gmra.mxu2 %vm356_vm9, %v473_v16  ;;  %1654 = vmatmul.msk.f32.vlgmr.msrb.gmra.mxu3 %vm356_vm9, %v503_v20  ;;  %v1756_v9 = vpop.permute.xlu2 %1755  ;;  %v482_v58 = vsel %vm2217_vm2, %v1808_v46, %v478_v23 }
 0x41e   :  { %v1757_v17 = vunpack.i.l.bf16 %v1756_v9  ;;  %v1758_v33 = vunpack.i.h.bf16 %v1756_v9  ;;  %v487_v35 = vsel %vm484_vm4, %v486_v31, %v482_v58 }
 0x41f   :  { %v488_v38 = vmul.f32 %v2093_v34, %v487_v35 }
 0x420   :  { %575 = vmatpush.msrb.mxu1 %v1757_v17 }
 0x422   :  { %576 = vmatpush.msrb.mxu1 %v1758_v33 }
 0x423   :  { %1657 = vmatmul.msk.f32.gmra.mxu0 %vm356_vm9, %v548_v37 }
 0x424   :  { %742 = vmatpush.msra.mxu1 %v723_v5  ;;  %v805_v5 = vperm.slane %v1991_v28, 3 }
 0x425   :  { %1653 = vmatmul.msk.f32.gmra.mxu2 %vm356_vm9, %v488_v38  ;;  %1655 = vmatmul.msk.f32.gmra.mxu3 %vm356_vm9, %v518_v39 }
 0x426   :  { %743 = vmatpush.msra.mxu1 %v722_v8 }
 0x428   :  { %744 = vmatpush.msra.mxu1 %v721_v11 }
 0x42a   :  { %745 = vmatpush.msra.mxu1 %v720_v12 }
 0x43b   :  { %v407_v6 = vpop.xlane.xlu0 %406 }
 0x43c   :  { %1809 = vrcp.f32 %v407_v6  ;;  %v440_v43 = vand.u32 2147483648, %v407_v6  ;;  %v438_v30 = vand.u32 2147483647, %v407_v6  ;;  %vm434_vm7 = vweird.f32 %v407_v6 }
 0x43e   :  { %v441_v46 = vor.u32 1.1754944e-38, %v440_v43  ;;  %vm439_vm11 = vcmp.eq.f32.partialorder %v438_v30, 8.507059e+37  ;;  %v41_v43 = vld [vmem:[%s2604_s1] sm:$0xff]  ;;  %v42_v30 = vld [vmem:[%s2604_s1 + $0x8] sm:$0xff] }
 0x442   :  { %v1810_v40 = vpop.eup %1809 }
 0x443   :  { %v430_v41 = vmul.f32 %v1810_v40, %v407_v6  ;;  %vm435_vm6 = vweird.f32 %v1810_v40  ;;  %v1668_v6 = vld [vmem:[%s2610_s7 + $0x50] sm:$0xff] }
 0x444   :  { %vm436_vm10 = vmor %vm434_vm7, %vm435_vm6 }
 0x445   :  { %v431_v42 = vsub.f32 1.0, %v430_v41 }
 0x447   :  { %v432_v44 = vmul.f32 %v1810_v40, %v431_v42  ;;  %v1666_v42 = vld [vmem:[%s2610_s7 + $0x40] sm:$0xff] }
 0x449   :  { %v433_v45 = vadd.f32 %v1810_v40, %v432_v44 }
 0x44b   :  { %v437_v34 = vsel %vm436_vm10, %v1810_v40, %v433_v45  ;;  %v1667_v40 = vld [vmem:[%s2610_s7 + $0x48] sm:$0xff] }
 0x44c   :  { %v442_v25 = vsel %vm439_vm11, %v441_v46, %v437_v34 }
 0x44d   :  { %v443_v48 = vmul.f32 %v2103_v47, %v442_v25 }
 0x44e   :  { %v410_v49 = vpop.xlane.xlu1 %409 }
 0x44f   :  { %1811 = vrcp.f32 %v410_v49  ;;  %1650 = vmatmul.msk.f32.vlgmr.msrb.gmra.mxu1 %vm356_vm9, %v443_v48  ;;  %v455_v53 = vand.u32 2147483648, %v410_v49  ;;  %v453_v55 = vand.u32 2147483647, %v410_v49  ;;  %vm449_vm13 = vweird.f32 %v410_v49 }
 0x451   :  { %v456_v57 = vor.u32 1.1754944e-38, %v455_v53  ;;  %vm454_vm15 = vcmp.eq.f32.partialorder %v453_v55, 8.507059e+37 }
 0x455   :  { %v1812_v50 = vpop.eup %1811 }
 0x456   :  { %v445_v51 = vmul.f32 %v1812_v50, %v410_v49  ;;  %vm450_vm12 = vweird.f32 %v1812_v50  ;;  %v1663_v49 = vld [vmem:[%s2610_s7 + $0x38] sm:$0xff] }
 0x457   :  { %vm451_vm14 = vmor %vm449_vm13, %vm450_vm12  ;;  %832 = vmatpush.msra.mxu2 %v1663_v49 }
 0x458   :  { %v446_v27 = vsub.f32 1.0, %v445_v51  ;;  %v1661_v51 = vld [vmem:[%s2610_s7 + $0x28] sm:$0xff] }
 0x45a   :  { %v447_v54 = vmul.f32 %v1812_v50, %v446_v27  ;;  %v1660_v27 = vld [vmem:[%s2610_s7 + $0x20] sm:$0xff] }
 0x45c   :  { %v448_v56 = vadd.f32 %v1812_v50, %v447_v54 }
 0x45e   :  { %v452_v60 = vsel %vm451_vm14, %v1812_v50, %v448_v56  ;;  %v1662_v50 = vld [vmem:[%s2610_s7 + $0x30] sm:$0xff] }
 0x45f   :  { %v457_v62 = vsel %vm454_vm15, %v456_v57, %v452_v60  ;;  %833 = vmatpush.msra.mxu2 %v1662_v50  ;;  %v883_v50 = vperm.slane %v2022_v7, 4 }
 0x460   :  { %v458_v47 = vmul.f32 %v2108_v52, %v457_v62 }
 0x461   :  { %834 = vmatpush.msra.mxu2 %v1661_v51 }
 0x462   :  { %1651 = vmatmul.msk.f32.gmra.mxu1 %vm356_vm9, %v458_v47 }
 0x463   :  { %835 = vmatpush.msra.mxu2 %v1660_v27 }
 0x498   :  { %v683_v1 = vpop.f32.mrf.mxu0 }
 0x499   :  { %707 = vrot.lane.b32.xlu2 %v683_v1, %s1888_s3 }
 0x4a0   :  { %v613_v59 = vpop.f32.mrf.mxu2  ;;  %v686_v3 = vpop.f32.mrf.mxu0 }
 0x4a1   :  { %691 = vrot.lane.b32.xlu2 %v613_v59, %s1889_s21  ;;  %709 = vrot.lane.b32.xlu1 %v686_v3, %s1888_s3  ;;  %v648_v4 = vpop.f32.mrf.mxu3  ;;  %v802_v59 = vperm.slane %v1991_v28, 2 }
 0x4a8   :  { %v616_v61 = vpop.f32.mrf.mxu2 }
 0x4a9   :  { %693 = vrot.lane.b32.xlu0 %v616_v61, %s1889_s21  ;;  %699 = vrot.lane.b32.xlu2 %v648_v4, %s1890_s22  ;;  %v651_v52 = vpop.f32.mrf.mxu3  ;;  %v848_v4 = vperm.slane %v2022_v7, 3 }
 0x4b1   :  { %701 = vrot.lane.b32.xlu2 %v651_v52, %s1890_s22 }
 0x4cc   :  { %v578_v15 = vpop.f32.mrf.mxu1 }
 0x4df   :  { %v581_v23 = vpop.f32.mrf.mxu1 }
 0x4f3   :  { %v708_v13 = vpop.permute.xlu2 %707 }
 0x4fb   :  { %v692_v14 = vpop.permute.xlu2 %691 }
 0x4fc   :  { %v713_v16 = vsel %vm203_vm8, %v578_v15, %v692_v14 }
 0x503   :  { %v700_v18 = vpop.permute.xlu2 %699 }
 0x504   :  { %v715_v20 = vsel %vm356_vm9, %v713_v16, %v700_v18 }
 0x505   :  { %v718_v22 = vsel %vm717_vm1, %v715_v20, %v708_v13 }
 0x506   :  { %1658 = vmatmul.msk.f32.vlgmr.msra.gmra.mxu1 %vm47_vm0, %v718_v22 }
 0x50b   :  { %v702_v21 = vpop.permute.xlu2 %701 }
 0x513   :  { %v710_v19 = vpop.permute.xlu1 %709 }
 0x51b   :  { %v694_v24 = vpop.permute.xlu0 %693 }
 0x51c   :  { %v714_v63 = vsel %vm203_vm8, %v581_v23, %v694_v24 }
 0x51d   :  { %v716_v9 = vsel %vm356_vm9, %v714_v63, %v702_v21 }
 0x51e   :  { %v719_v58 = vsel %vm717_vm1, %v716_v9, %v710_v19 }
 0x51f   :  { %1659 = vmatmul.msk.f32.gmra.mxu1 %vm47_vm0, %v719_v58 }
 0x583   :  { %v747_v29 = vpop.f32.mrf.mxu1 }
 0x584   :  { %v753_v31 = vadd.f32 %v747_v29, %v1956_v0  ;;  %v1669_v0 = vld [vmem:[%s2610_s7 + $0x58] sm:$0xff] }
 0x585   :  { %867 = vmatpush.msra.mxu3 %v1669_v0  ;;  %v1675_v0 = vld [vmem:[%s2610_s7 + $0x78] sm:$0xff] }
 0x586   :  { %v2266_v17 = vadd.f32 %v755_v26, %v753_v31  ;;  %902 = vmatpush.msrb.mxu0 %v1675_v0 }
 0x587   :  { %868 = vmatpush.msra.mxu3 %v1668_v6  ;;  %v1674_v6 = vld [vmem:[%s2610_s7 + $0x70] sm:$0xff] }
 0x588   :  { %v758_v32 = vsel %vm47_vm0, %v2266_v17, 0.0  ;;  %903 = vmatpush.msrb.mxu0 %v1674_v6 }
 0x589   :  { %759 = vadd.xlane.f32.xlu2 %v758_v32  ;;  %869 = vmatpush.msra.mxu3 %v1667_v40  ;;  %v1672_v40 = vld [vmem:[%s2610_s7 + $0x60] sm:$0xff] }
 0x58b   :  { %870 = vmatpush.msra.mxu3 %v1666_v42  ;;  %v44_v42 = vld [vmem:[%s2605_s2 + $0x8] sm:$0xff] }
 0x58c   :  { %1670 = vmatmul.msk.f32.vlgmr.msra.gmra.mxu3 %vm47_vm0, %v41_v43 }
 0x594   :  { %1671 = vmatmul.msk.f32.gmra.mxu3 %vm47_vm0, %v42_v30 }
 0x59c   :  { %v750_v33 = vpop.f32.mrf.mxu1 }
 0x59d   :  { %v754_v35 = vadd.f32 %v750_v33, %v1963_v2 }
 0x59f   :  { %v2271_v36 = vadd.f32 %v755_v26, %v754_v35  ;;  %v813_v26 = vperm.slane %v2022_v7, 2 }
 0x5a1   :  { %v761_v37 = vsel %vm47_vm0, %v2271_v36, 0.0 }
 0x5a2   :  { %762 = vadd.xlane.f32.xlu0 %v761_v37 }
 0x5fc   :  { %v760_v38 = vpop.xlane.xlu2 %759 }
 0x5fd   :  { %v764_v39 = vmul.f32 %v760_v38, %v1967_v10 }
 0x5ff   :  { %v766_v2 = vsub.f32 %v2266_v17, %v764_v39 }
 0x601   :  { %v768_v41 = vmul.f32 %v766_v2, %v766_v2 }
 0x603   :  { %v770_v44 = vsel %vm47_vm0, %v768_v41, 0.0  ;;  %v43_v41 = vld [vmem:[%s2605_s2] sm:$0xff] }
 0x604   :  { %771 = vadd.xlane.f32.xlu1 %v770_v44 }
 0x60f   :  { %v872_v61 = vpop.f32.mrf.mxu3 }
 0x610   :  { %v873_v8 = vadd.f32 %v872_v61, %v848_v4 }
 0x615   :  { %v763_v45 = vpop.xlane.xlu0 %762 }
 0x616   :  { %v765_v46 = vmul.f32 %v763_v45, %v1967_v10 }
 0x617   :  { %v875_v16 = vpop.f32.mrf.mxu3 }
 0x618   :  { %v767_v34 = vsub.f32 %v2271_v36, %v765_v46  ;;  %v876_v18 = vadd.f32 %v875_v16, %v848_v4 }
 0x61a   :  { %v769_v25 = vmul.f32 %v767_v34, %v767_v34  ;;  %937 = vrot.lane.b32.xlu0 %v876_v18, %s1884_s12  ;;  %1678 = vmatpush.xpose.msk.msrb.mxu1 %vm203_vm8, %v876_v18 }
 0x61c   :  { %v773_v48 = vsel %vm47_vm0, %v769_v25, 0.0 }
 0x61d   :  { %774 = vadd.xlane.f32.xlu2 %v773_v48  ;;  %931 = vrot.lane.b32.xlu1 %v873_v8, %s1883_s6 }
 0x61e   :  { %1679 = vmatpush.xpose.msk.msrb.mxu1 %vm203_vm8, %v873_v8 }
 0x625   :  { %939 = vrot.lane.b32.xlu1 %v873_v8, %s1885_s13 }
 0x635   :  { %933 = vrot.lane.b32.xlu2 %v876_v18, %s1883_s6 }
 0x63d   :  { %935 = vrot.lane.b32.xlu2 %v873_v8, %s1884_s12 }
 0x677   :  { %v772_v53 = vpop.xlane.xlu1 %771 }
 0x678   :  { %v776_v54 = vmul.f32 %v772_v53, %v1967_v10 }
 0x67a   :  { %v778_v55 = vadd.f32 1e-06, %v776_v54 }
 0x67c   :  { %1813 = vrsqrt.f32 %v778_v55  ;;  %vm786_vm3 = vweird.f32 %v778_v55 }
 0x682   :  { %v1814_v56 = vpop.eup %1813 }
 0x683   :  { %v781_v57 = vmul.f32 %v1814_v56, %v778_v55  ;;  %vm787_vm2 = vweird.f32 %v1814_v56 }
 0x684   :  { %vm788_vm4 = vmor %vm786_vm3, %vm787_vm2 }
 0x685   :  { %v782_v60 = vmul.f32 %v1814_v56, %v781_v57 }
 0x687   :  { %v783_v62 = vmul.f32 0.5, %v782_v60 }
 0x689   :  { %v784_v47 = vsub.f32 1.5, %v783_v62 }
 0x68b   :  { %v785_v1 = vmul.f32 %v1814_v56, %v784_v47 }
 0x68c   :  { %v938_v33 = vpop.permute.xlu0 %937 }
 0x68d   :  { %v789_v3 = vsel %vm788_vm4, %v1814_v56, %v785_v1  ;;  %1686 = vmatpush.xpose.msk.msrb.mxu3 %vm203_vm8, %v938_v33  ;;  %v913_v56 = vld [vmem:[%s2607_s4] sm:$0xff] }
 0x68e   :  { %v800_v52 = vmul.f32 %v789_v3, %v766_v2  ;;  %v1673_v2 = vld [vmem:[%s2610_s7 + $0x68] sm:$0xff] }
 0x68f   :  { %v932_v39 = vpop.permute.xlu1 %931  ;;  %904 = vmatpush.msrb.mxu0 %v1673_v2 }
 0x690   :  { %v803_v11 = vmul.f32 %v802_v59, %v800_v52  ;;  %v775_v12 = vpop.xlane.xlu2 %774 }
 0x691   :  { %v777_v13 = vmul.f32 %v775_v12, %v1967_v10  ;;  %905 = vmatpush.msrb.mxu0 %v1672_v40 }
 0x692   :  { %v806_v14 = vadd.f32 %v805_v5, %v803_v11  ;;  %1676 = vmatmul.msk.f32.vlgmr.msrb.gmra.mxu0 %vm47_vm0, %v43_v41 }
 0x693   :  { %v779_v15 = vadd.f32 1e-06, %v777_v13 }
 0x694   :  { %1664 = vmatmul.msk.f32.vlgmr.msra.gmra.mxu2 %vm47_vm0, %v806_v14 }
 0x695   :  { %1815 = vrsqrt.f32 %v779_v15  ;;  %vm796_vm6 = vweird.f32 %v779_v15 }
 0x697   :  { %v940_v46 = vpop.permute.xlu1 %939 }
 0x698   :  { %v934_v32 = vpop.permute.xlu2 %933 }
 0x699   :  { %1682 = vmatpush.xpose.msk.msrb.mxu2 %vm203_vm8, %v934_v32 }
 0x69a   :  { %1677 = vmatmul.msk.f32.gmra.mxu0 %vm47_vm0, %v44_v42 }
 0x69b   :  { %v1816_v28 = vpop.eup %1815 }
 0x69c   :  { %v791_v20 = vmul.f32 %v1816_v28, %v779_v15  ;;  %vm797_vm5 = vweird.f32 %v1816_v28 }
 0x69d   :  { %vm798_vm7 = vmor %vm796_vm6, %vm797_vm5  ;;  %1683 = vmatpush.xpose.msk.msrb.mxu2 %vm203_vm8, %v932_v39 }
 0x69e   :  { %v792_v22 = vmul.f32 %v1816_v28, %v791_v20 }
 0x6a0   :  { %v793_v23 = vmul.f32 0.5, %v792_v22  ;;  %v936_v35 = vpop.permute.xlu2 %935 }
 0x6a1   :  { %1687 = vmatpush.xpose.msk.msrb.mxu3 %vm203_vm8, %v936_v35 }
 0x6a2   :  { %v794_v24 = vsub.f32 1.5, %v793_v23 }
 0x6a4   :  { %v795_v21 = vmul.f32 %v1816_v28, %v794_v24 }
 0x6a6   :  { %v799_v63 = vsel %vm798_vm7, %v1816_v28, %v795_v21 }
 0x6a7   :  { %v801_v19 = vmul.f32 %v799_v63, %v767_v34 }
 0x6a9   :  { %v804_v9 = vmul.f32 %v802_v59, %v801_v19 }
 0x6ab   :  { %v807_v58 = vadd.f32 %v805_v5, %v804_v9  ;;  %v914_v5 = vld [vmem:[%s2607_s4 + $0x8] sm:$0xff] }
 0x6ad   :  { %1665 = vmatmul.msk.f32.gmra.mxu2 %vm47_vm0, %v807_v58 }
 0x70f   :  { %v907_v49 = vpop.f32.mrf.mxu0 }
 0x710   :  { %v908_v27 = vadd.f32 %v907_v49, %v883_v50 }
 0x717   :  { %v837_v29 = vpop.f32.mrf.mxu2  ;;  %v910_v51 = vpop.f32.mrf.mxu0 }
 0x718   :  { %v838_v31 = vadd.f32 %v837_v29, %v813_v26  ;;  %v911_v53 = vadd.f32 %v910_v51, %v883_v50 }
 0x71a   :  { %921 = vrot.lane.b32.xlu2 %v838_v31, %s1884_s12  ;;  %917 = vrot.lane.b32.xlu0 %v838_v31, %s1883_s6  ;;  %v2374_v62 = vpack.i.bf16 %v908_v27, %v911_v53 }
 0x71b   :  { %1680 = vmatmul.msk.f32.vlgmr.msrb.gmra.mxu1 %vm203_vm8, %v838_v31 }
 0x71c   :  { %1315 = vmatpush.msra.mxu1 %v911_v53 }
 0x71e   :  { %1316 = vmatpush.msra.mxu1 %v908_v27 }
 0x722   :  { %941 = vrot.lane.b32.xlu0 %v876_v18, %s1885_s13 }
 0x730   :  { %v840_v37 = vpop.f32.mrf.mxu2 }
 0x731   :  { %v841_v38 = vadd.f32 %v840_v37, %v813_v26 }
 0x733   :  { %919 = vrot.lane.b32.xlu2 %v841_v38, %s1883_s6  ;;  %923 = vrot.lane.b32.xlu0 %v841_v38, %s1884_s12 }
 0x734   :  { %1681 = vmatmul.msk.f32.gmra.mxu1 %vm203_vm8, %v841_v38 }
 0x73b   :  { %925 = vrot.lane.b32.xlu2 %v838_v31, %s1885_s13  ;;  %927 = vrot.lane.b32.xlu0 %v841_v38, %s1885_s13 }
 0x774   :  { %v922_v43 = vpop.permute.xlu2 %921 }
 0x775   :  { %1688 = vmatmul.msk.f32.vlgmr.msrb.gmra.mxu3 %vm203_vm8, %v922_v43 }
 0x78c   :  { %v918_v44 = vpop.permute.xlu0 %917 }
 0x78d   :  { %1684 = vmatmul.msk.f32.vlgmr.msrb.gmra.mxu2 %vm203_vm8, %v918_v44  ;;  %v920_v30 = vpop.permute.xlu2 %919 }
 0x794   :  { %v942_v45 = vpop.permute.xlu0 %941 }
 0x795   :  { %1685 = vmatmul.msk.f32.gmra.mxu2 %vm203_vm8, %v920_v30  ;;  %1690 = vmatpush.xpose.msk.msra.mxu0 %vm203_vm8, %v942_v45  ;;  %v926_v34 = vpop.permute.xlu2 %925 }
 0x798   :  { %v988_v8 = vpop.f32.mrf.mxu1 }
 0x799   :  { %1691 = vmatpush.xpose.msk.msra.mxu0 %vm203_vm8, %v940_v46  ;;  %v1087_v14 = vmul.f32 0.35355338, %v988_v8 }
 0x79b   :  { %v2382_v16 = vadd.f32 %v1087_v14, %v913_v56 }
 0x79c   :  { %1692 = vmatmul.msk.f32.vlgmr.msra.gmra.mxu0 %vm203_vm8, %v926_v34 }
 0x79d   :  { %v1103_v18 = vsel %vm356_vm9, %v2382_v16, -inf }
 0x7a5   :  { %v924_v25 = vpop.permute.xlu0 %923 }
 0x7a6   :  { %1689 = vmatmul.msk.f32.gmra.mxu3 %vm203_vm8, %v924_v25 }
 0x7ad   :  { %v928_v48 = vpop.permute.xlu0 %927 }
 0x7ae   :  { %1693 = vmatmul.msk.f32.gmra.mxu0 %vm203_vm8, %v928_v48 }
 0x7b1   :  { %v991_v21 = vpop.f32.mrf.mxu1 }
 0x7b2   :  { %v1088_v9 = vmul.f32 0.35355338, %v991_v21 }
 0x7b4   :  { %v1096_v26 = vadd.f32 %v1088_v9, %v914_v5 }
 0x7b6   :  { %v1106_v29 = vsel %vm356_vm9, %v1096_v26, -inf }
 0x7f8   :  { %v1050_v54 = vpop.f32.mrf.mxu3 }
 0x7f9   :  { %v1091_v55 = vmul.f32 0.35355338, %v1050_v54 }
 0x7fb   :  { %v1099_v57 = vadd.f32 %v1091_v55, %v913_v56 }
 0x7fd   :  { %v1115_v60 = vsel %vm356_vm9, %v1099_v57, -inf }
 0x7fe   :  { %1116 = vmax.xlane.f32.xlu2 %v1115_v60 }
 0x810   :  { %v1019_v47 = vpop.f32.mrf.mxu2 }
 0x811   :  { %v1089_v1 = vmul.f32 0.35355338, %v1019_v47 }
 0x813   :  { %v1097_v7 = vadd.f32 %v1089_v1, %v913_v56 }
 0x815   :  { %v1109_v59 = vsel %vm356_vm9, %v1097_v7, -inf }
 0x816   :  { %1110 = vmax.xlane.f32.xlu1 %v1109_v59 }
 0x818   :  { %v1022_v3 = vpop.f32.mrf.mxu2 }
 0x819   :  { %v1090_v4 = vmul.f32 0.35355338, %v1022_v3  ;;  %v1081_v61 = vpop.f32.mrf.mxu0 }
 0x81a   :  { %v1093_v52 = vmul.f32 0.35355338, %v1081_v61 }
 0x81b   :  { %v1098_v11 = vadd.f32 %v1090_v4, %v914_v5 }
 0x81c   :  { %v1101_v12 = vadd.f32 %v1093_v52, %v913_v56 }
 0x81d   :  { %v1112_v13 = vsel %vm356_vm9, %v1098_v11, -inf }
 0x81e   :  { %1113 = vmax.xlane.f32.xlu0 %v1112_v13  ;;  %v1121_v15 = vsel %vm356_vm9, %v1101_v12, -inf }
 0x81f   :  { %1122 = vmax.xlane.f32.xlu1 %v1121_v15 }
 0x827   :  { %1104 = vmax.xlane.f32.xlu1 %v1103_v18 }
 0x829   :  { %v1053_v28 = vpop.f32.mrf.mxu3 }
 0x82a   :  { %v1092_v20 = vmul.f32 0.35355338, %v1053_v28 }
 0x82b   :  { %v1084_v22 = vpop.f32.mrf.mxu0 }
 0x82c   :  { %v1094_v23 = vmul.f32 0.35355338, %v1084_v22  ;;  %v1100_v24 = vadd.f32 %v1092_v20, %v914_v5 }
 0x82e   :  { %v1118_v63 = vsel %vm356_vm9, %v1100_v24, -inf  ;;  %v1102_v19 = vadd.f32 %v1094_v23, %v914_v5 }
 0x82f   :  { %1119 = vmax.xlane.f32.xlu2 %v1118_v63 }
 0x830   :  { %v1124_v58 = vsel %vm356_vm9, %v1102_v19, -inf }
 0x831   :  { %1125 = vmax.xlane.f32.xlu0 %v1124_v58 }
 0x839   :  { %1107 = vmax.xlane.f32.xlu0 %v1106_v29 }
 0x871   :  { %v1117_v31 = vpop.xlane.xlu2 %1116 }
 0x872   :  { %v1131_v32 = vsub.f32 %v1099_v57, %v1117_v31 }
 0x874   :  { %v1143_v33 = vmul.f32 1.442695, %v1131_v32 }
 0x876   :  { %1817 = vpow2.f32 %v1143_v33 }
 0x87c   :  { %v2389_v35 = vpop.eup %1817 }
 0x87d   :  { %v1163_v37 = vsel %vm356_vm9, %v2389_v35, 0.0 }
 0x87e   :  { %1164 = vadd.xlane.f32.xlu1 %v1163_v37 }
 0x889   :  { %v1111_v38 = vpop.xlane.xlu1 %1110 }
 0x88a   :  { %v1129_v39 = vsub.f32 %v1097_v7, %v1111_v38 }
 0x88c   :  { %v1139_v0 = vmul.f32 1.442695, %v1129_v39 }
 0x88e   :  { %1819 = vpow2.f32 %v1139_v0 }
 0x891   :  { %v1114_v43 = vpop.xlane.xlu0 %1113 }
 0x892   :  { %v1123_v6 = vpop.xlane.xlu1 %1122  ;;  %v1130_v49 = vsub.f32 %v1098_v11, %v1114_v43 }
 0x893   :  { %v1133_v2 = vsub.f32 %v1101_v12, %v1123_v6 }
 0x894   :  { %v2393_v40 = vpop.eup %1819  ;;  %v1141_v51 = vmul.f32 1.442695, %v1130_v49 }
 0x895   :  { %v1147_v41 = vmul.f32 1.442695, %v1133_v2  ;;  %v1157_v42 = vsel %vm356_vm9, %v2393_v40, 0.0 }
 0x896   :  { %1158 = vadd.xlane.f32.xlu2 %v1157_v42 }
 0x897   :  { %1821 = vpow2.f32 %v1147_v41 }
 0x89a   :  { %v1105_v60 = vpop.xlane.xlu1 %1104 }
 0x89b   :  { %v1127_v47 = vsub.f32 %v2382_v16, %v1105_v60 }
 0x89d   :  { %v2397_v44 = vpop.eup %1821  ;;  %v1135_v1 = vmul.f32 1.442695, %v1127_v47 }
 0x89e   :  { %v1169_v30 = vsel %vm356_vm9, %v2397_v44, 0.0 }
 0x89f   :  { %1170 = vadd.xlane.f32.xlu0 %v1169_v30 }
 0x8a2   :  { %v1120_v45 = vpop.xlane.xlu2 %1119 }
 0x8a3   :  { %v1132_v46 = vsub.f32 %v1100_v24, %v1120_v45 }
 0x8a4   :  { %v1126_v34 = vpop.xlane.xlu0 %1125 }
 0x8a5   :  { %v1145_v25 = vmul.f32 1.442695, %v1132_v46  ;;  %v1134_v48 = vsub.f32 %v1102_v19, %v1126_v34 }
 0x8a7   :  { %1823 = vpow2.f32 %v1145_v25  ;;  %v1149_v50 = vmul.f32 1.442695, %v1134_v48 }
 0x8a9   :  { %1825 = vpow2.f32 %v1149_v50 }
 0x8aa   :  { %1827 = vpow2.f32 %v1141_v51 }
 0x8ab   :  { %1829 = vpow2.f32 %v1135_v1 }
 0x8ac   :  { %v1108_v3 = vpop.xlane.xlu0 %1107 }
 0x8ad   :  { %v2401_v27 = vpop.eup %1823  ;;  %v1128_v4 = vsub.f32 %v1096_v26, %v1108_v3 }
 0x8ae   :  { %v1166_v53 = vsel %vm356_vm9, %v2401_v27, 0.0 }
 0x8af   :  { %v2405_v54 = vpop.eup %1825  ;;  %1167 = vadd.xlane.f32.xlu1 %v1166_v53  ;;  %v1137_v61 = vmul.f32 1.442695, %v1128_v4 }
 0x8b0   :  { %v1172_v55 = vsel %vm356_vm9, %v2405_v54, 0.0  ;;  %v2411_v56 = vpop.eup %1827 }
 0x8b1   :  { %1173 = vadd.xlane.f32.xlu2 %v1172_v55  ;;  %v1160_v57 = vsel %vm356_vm9, %v2411_v56, 0.0  ;;  %v2420_v7 = vpop.eup %1829  ;;  %1831 = vpow2.f32 %v1137_v61 }
 0x8b2   :  { %v1151_v59 = vsel %vm356_vm9, %v2420_v7, 0.0 }
 0x8b3   :  { %1760 = vrot.lane.b32.xlu0 %v2374_v62, %s1883_s6 }
 0x8b7   :  { %v2424_v52 = vpop.eup %1831 }
 0x8b8   :  { %v1154_v5 = vsel %vm356_vm9, %v2424_v52, 0.0 }
 0x8b9   :  { %1161 = vadd.xlane.f32.xlu2 %v1160_v57 }
 0x8c8   :  { %1765 = vrot.lane.b32.xlu1 %v2374_v62, %s1884_s12 }
 0x8d1   :  { %1770 = vrot.lane.b32.xlu2 %v2374_v62, %s1885_s13 }
 0x8dd   :  { %1152 = vadd.xlane.f32.xlu0 %v1151_v59 }
 0x8f1   :  { %v2428_v14 = vpop.xlane.xlu1 %1164 }
 0x8f2   :  { %1155 = vadd.xlane.f32.xlu1 %v1154_v5  ;;  %v1246_v48 = vand.u32 2147483648, %v2428_v14  ;;  %vm1240_vm5 = vweird.f32 %v2428_v14  ;;  %v1244_v55 = vand.u32 2147483647, %v2428_v14 }
 0x8f4   :  { %v1247_v59 = vor.u32 1.1754944e-38, %v1246_v48 }
 0x909   :  { %v1159_v8 = vpop.xlane.xlu2 %1158 }
 0x90a   :  { %1833 = vrcp.f32 %v1159_v8  ;;  %v1216_v20 = vand.u32 2147483648, %v1159_v8  ;;  %vm1210_vm11 = vweird.f32 %v1159_v8  ;;  %v1214_v22 = vand.u32 2147483647, %v1159_v8 }
 0x90c   :  { %v1217_v63 = vor.u32 1.1754944e-38, %v1216_v20  ;;  %vm1215_vm13 = vcmp.eq.f32.partialorder %v1214_v22, 8.507059e+37 }
 0x910   :  { %v1834_v62 = vpop.eup %1833 }
 0x911   :  { %v1206_v11 = vmul.f32 %v1834_v62, %v1159_v8  ;;  %vm1211_vm10 = vweird.f32 %v1834_v62 }
 0x912   :  { %v1171_v12 = vpop.xlane.xlu0 %1170  ;;  %vm1212_vm12 = vmor %vm1210_vm11, %vm1211_vm10 }
 0x913   :  { %1835 = vrcp.f32 %v1171_v12  ;;  %v1207_v13 = vsub.f32 1.0, %v1206_v11  ;;  %v1276_v6 = vand.u32 2147483648, %v1171_v12  ;;  %vm1270_vm15 = vweird.f32 %v1171_v12 }
 0x914   :  { %1837 = vrcp.f32 %v2428_v14  ;;  %v1274_v30 = vand.u32 2147483647, %v1171_v12 }
 0x915   :  { %v1208_v15 = vmul.f32 %v1834_v62, %v1207_v13  ;;  %v1277_v46 = vor.u32 1.1754944e-38, %v1276_v6 }
 0x916   :  { %vm1275_vm4 = vcmp.eq.f32.partialorder %v1274_v30, 8.507059e+37 }
 0x917   :  { %v1209_v18 = vadd.f32 %v1834_v62, %v1208_v15 }
 0x919   :  { %v1836_v16 = vpop.eup %1835  ;;  %v1213_v24 = vsel %vm1212_vm12, %v1834_v62, %v1209_v18  ;;  %vm1245_vm12 = vcmp.eq.f32.partialorder %v1244_v55, 8.507059e+37 }
 0x91a   :  { %v1266_v28 = vmul.f32 %v1836_v16, %v1171_v12  ;;  %v2431_v23 = vpop.eup %1837  ;;  %v1218_v29 = vsel %vm1215_vm13, %v1217_v63, %v1213_v24  ;;  %vm1271_vm14 = vweird.f32 %v1836_v16 }
 0x91b   :  { %v1236_v58 = vmul.f32 %v2431_v23, %v2428_v14  ;;  %v1219_v38 = vmul.f32 %v2393_v40, %v1218_v29  ;;  %vm1272_vm2 = vmor %vm1270_vm15, %vm1271_vm14  ;;  %vm1241_vm3 = vweird.f32 %v2431_v23 }
 0x91c   :  { %v1267_v21 = vsub.f32 1.0, %v1266_v28  ;;  %vm2457_vm6 = vmor %vm1240_vm5, %vm1241_vm3 }
 0x91d   :  { %v1237_v37 = vsub.f32 1.0, %v1236_v58 }
 0x91e   :  { %v1268_v32 = vmul.f32 %v1836_v16, %v1267_v21 }
 0x91f   :  { %v1238_v43 = vmul.f32 %v2431_v23, %v1237_v37 }
 0x920   :  { %v1269_v0 = vadd.f32 %v1836_v16, %v1268_v32 }
 0x921   :  { %v1239_v25 = vadd.f32 %v2431_v23, %v1238_v43 }
 0x922   :  { %v2433_v19 = vpop.xlane.xlu1 %1167  ;;  %v1273_v45 = vsel %vm1272_vm2, %v1836_v16, %v1269_v0 }
 0x923   :  { %v1278_v49 = vsel %vm1275_vm4, %v1277_v46, %v1273_v45  ;;  %v1243_v1 = vsel %vm2457_vm6, %v2431_v23, %v1239_v25  ;;  %vm1255_vm5 = vweird.f32 %v2433_v19 }
 0x924   :  { %v2435_v9 = vpop.xlane.xlu2 %1173  ;;  %v1279_v4 = vmul.f32 %v2397_v44, %v1278_v49  ;;  %v1248_v16 = vsel %vm1245_vm12, %v1247_v59, %v1243_v1 }
 0x925   :  { %1839 = vrcp.f32 %v2435_v9  ;;  %v1761_v26 = vpop.permute.xlu0 %1760  ;;  %vm1285_vm7 = vweird.f32 %v2435_v9  ;;  %v1291_v8 = vand.u32 2147483648, %v2435_v9  ;;  %v1289_v12 = vand.u32 2147483647, %v2435_v9 }
 0x926   :  { %v1762_v31 = vunpack.i.l.bf16 %v1761_v26  ;;  %1841 = vrcp.f32 %v2433_v19  ;;  %v1763_v33 = vunpack.i.h.bf16 %v1761_v26  ;;  %v1249_v32 = vmul.f32 %v2389_v35, %v1248_v16 }
 0x927   :  { %v1292_v22 = vor.u32 1.1754944e-38, %v1291_v8  ;;  %vm1290_vm2 = vcmp.eq.f32.partialorder %v1289_v12, 8.507059e+37  ;;  %v1703_v8 = vld [vmem:[%s2610_s7 + $0x88] sm:$0xff] }
 0x928   :  { %1344 = vmatpush.msra.mxu2 %v1762_v31 }
 0x92a   :  { %1345 = vmatpush.msra.mxu2 %v1763_v33  ;;  %v1259_v33 = vand.u32 2147483647, %v2433_v19 }
 0x92b   :  { %v2442_v39 = vpop.eup %1839  ;;  %1696 = vmatmul.msk.f32.vlgmr.msra.gmra.mxu2 %vm356_vm9, %v1219_v38 }
 0x92c   :  { %v1281_v2 = vmul.f32 %v2442_v39, %v2435_v9  ;;  %v1162_v41 = vpop.xlane.xlu2 %1161  ;;  %v2447_v42 = vpop.eup %1841  ;;  %vm1286_vm10 = vweird.f32 %v2442_v39  ;;  %v1261_v9 = vand.u32 2147483648, %v2433_v19 }
 0x92d   :  { %1843 = vrcp.f32 %v1162_v41  ;;  %v1251_v34 = vmul.f32 %v2447_v42, %v2433_v19  ;;  %v1231_v62 = vand.u32 2147483648, %v1162_v41  ;;  %v1229_v15 = vand.u32 2147483647, %v1162_v41  ;;  %vm2474_vm13 = vmor %vm1285_vm7, %vm1286_vm10 }
 0x92e   :  { %v1282_v40 = vsub.f32 1.0, %v1281_v2  ;;  %vm1225_vm14 = vweird.f32 %v1162_v41  ;;  %vm1256_vm4 = vweird.f32 %v2447_v42  ;;  %vm1260_vm7 = vcmp.eq.f32.partialorder %v1259_v33, 8.507059e+37 }
 0x92f   :  { %v1252_v57 = vsub.f32 1.0, %v1251_v34  ;;  %v1232_v23 = vor.u32 1.1754944e-38, %v1231_v62  ;;  %vm1230_vm3 = vcmp.eq.f32.partialorder %v1229_v15, 8.507059e+37  ;;  %vm1257_vm6 = vmor %vm1255_vm5, %vm1256_vm4  ;;  %v1702_v62 = vld [vmem:[%s2610_s7 + $0x80] sm:$0xff] }
 0x930   :  { %v1283_v50 = vmul.f32 %v2442_v39, %v1282_v40 }
 0x931   :  { %v1253_v13 = vmul.f32 %v2447_v42, %v1252_v57 }
 0x932   :  { %v1284_v5 = vadd.f32 %v2442_v39, %v1283_v50 }
 0x933   :  { %v1844_v51 = vpop.eup %1843  ;;  %v1254_v63 = vadd.f32 %v2447_v42, %v1253_v13 }
 0x934   :  { %v1221_v60 = vmul.f32 %v1844_v51, %v1162_v41  ;;  %v1771_v47 = vpop.permute.xlu2 %1770  ;;  %vm1226_vm11 = vweird.f32 %v1844_v51  ;;  %v1288_v20 = vsel %vm2474_vm13, %v2442_v39, %v1284_v5  ;;  %v1262_v39 = vor.u32 1.1754944e-38, %v1261_v9  ;;  %v1704_v5 = vld [vmem:[%s2610_s7 + $0x90] sm:$0xff] }
 0x935   :  { %v1772_v3 = vunpack.i.l.bf16 %v1771_v47  ;;  %v1773_v11 = vunpack.i.h.bf16 %v1771_v47  ;;  %vm1227_vm15 = vmor %vm1225_vm14, %vm1226_vm11  ;;  %v1293_v29 = vsel %vm1290_vm2, %v1292_v22, %v1288_v20  ;;  %v1258_v38 = vsel %vm1257_vm6, %v2447_v42, %v1254_v63  ;;  %v2529_v63 = vld [vmem:[%s2608_s5 + $0x8] sm:$0x7f] }
 0x936   :  { %v1222_v61 = vsub.f32 1.0, %v1221_v60  ;;  %v1294_v37 = vmul.f32 %v2405_v54, %v1293_v29  ;;  %v1263_v0 = vsel %vm1260_vm7, %v1262_v39, %v1258_v38  ;;  %v1477_v9 = vperm.slane %v2529_v63, 5 }
 0x937   :  { %1402 = vmatpush.msrb.mxu0 %v1772_v3  ;;  %vm1577_vm7 = vcmask 523264  }
 0x938   :  { %v1223_v14 = vmul.f32 %v1844_v51, %v1222_v61 }
 0x939   :  { %1403 = vmatpush.msrb.mxu0 %v1773_v11 }
 0x93a   :  { %1700 = vmatmul.msk.f32.vlgmr.msrb.gmra.mxu0 %vm356_vm9, %v1279_v4  ;;  %v1766_v18 = vpop.permute.xlu1 %1765  ;;  %v1224_v28 = vadd.f32 %v1844_v51, %v1223_v14 }
 0x93b   :  { %v1767_v24 = vunpack.i.l.bf16 %v1766_v18  ;;  %v1768_v58 = vunpack.i.h.bf16 %v1766_v18 }
 0x93c   :  { %v1228_v21 = vsel %vm1227_vm15, %v1844_v51, %v1224_v28 }
 0x93d   :  { %1373 = vmatpush.msra.mxu3 %v1767_v24  ;;  %v1233_v26 = vsel %vm1230_vm3, %v1232_v23, %v1228_v21 }
 0x93e   :  { %v1234_v31 = vmul.f32 %v2411_v56, %v1233_v26  ;;  %v1264_v56 = vmul.f32 %v2401_v27, %v1263_v0 }
 0x93f   :  { %1374 = vmatpush.msra.mxu3 %v1768_v58 }
 0x940   :  { %1697 = vmatmul.msk.f32.gmra.mxu2 %vm356_vm9, %v1234_v31  ;;  %1698 = vmatmul.msk.f32.vlgmr.msra.gmra.mxu3 %vm356_vm9, %v1249_v32 }
 0x942   :  { %1701 = vmatmul.msk.f32.gmra.mxu0 %vm356_vm9, %v1294_v37 }
 0x948   :  { %1699 = vmatmul.msk.f32.gmra.mxu3 %vm356_vm9, %v1264_v56 }
 0x950   :  { %v1153_v35 = vpop.xlane.xlu0 %1152 }
 0x951   :  { %1845 = vrcp.f32 %v1153_v35  ;;  %v1186_v41 = vand.u32 2147483648, %v1153_v35  ;;  %v1184_v54 = vand.u32 2147483647, %v1153_v35  ;;  %vm1180_vm11 = vweird.f32 %v1153_v35 }
 0x953   :  { %v1187_v42 = vor.u32 1.1754944e-38, %v1186_v41  ;;  %vm1185_vm13 = vcmp.eq.f32.partialorder %v1184_v54, 8.507059e+37  ;;  %v1532_v54 = vld [vmem:[%s2611_s8 + $0x10] sm:$0xff] }
 0x957   :  { %v1846_v19 = vpop.eup %1845 }
 0x958   :  { %v1176_v6 = vmul.f32 %v1846_v19, %v1153_v35  ;;  %vm1181_vm10 = vweird.f32 %v1846_v19 }
 0x959   :  { %vm1182_vm12 = vmor %vm1180_vm11, %vm1181_vm10 }
 0x95a   :  { %v1177_v2 = vsub.f32 1.0, %v1176_v6 }
 0x95c   :  { %v1178_v43 = vmul.f32 %v1846_v19, %v1177_v2 }
 0x95e   :  { %v1179_v30 = vadd.f32 %v1846_v19, %v1178_v43  ;;  %v1533_v43 = vld [vmem:[%s2611_s8 + $0x18] sm:$0xff] }
 0x95f   :  { %1556 = vmatpush.msrb.mxu2 %v1533_v43 }
 0x960   :  { %v1183_v40 = vsel %vm1182_vm12, %v1846_v19, %v1179_v30  ;;  %v1531_v30 = vld [vmem:[%s2611_s8 + $0x8] sm:$0xff] }
 0x961   :  { %v1188_v45 = vsel %vm1185_vm13, %v1187_v42, %v1183_v40  ;;  %1557 = vmatpush.msrb.mxu2 %v1532_v54  ;;  %v1530_v42 = vld [vmem:[%s2611_s8] sm:$0xff] }
 0x962   :  { %v1189_v27 = vmul.f32 %v2420_v7, %v1188_v45 }
 0x963   :  { %1558 = vmatpush.msrb.mxu2 %v1531_v30 }
 0x964   :  { %1694 = vmatmul.msk.f32.vlgmr.msra.gmra.mxu1 %vm356_vm9, %v1189_v27 }
 0x965   :  { %v1156_v46 = vpop.xlane.xlu1 %1155  ;;  %1559 = vmatpush.msrb.mxu2 %v1530_v42 }
 0x966   :  { %1847 = vrcp.f32 %v1156_v46  ;;  %v1201_v49 = vand.u32 2147483648, %v1156_v46  ;;  %v1199_v51 = vand.u32 2147483647, %v1156_v46  ;;  %vm1195_vm15 = vweird.f32 %v1156_v46 }
 0x968   :  { %v1202_v55 = vor.u32 1.1754944e-38, %v1201_v49  ;;  %vm1200_vm3 = vcmp.eq.f32.partialorder %v1199_v51, 8.507059e+37  ;;  %v1854_v51 = vld [vmem:[%s2608_s5] sm:$0xff] }
 0x96c   :  { %v1848_v34 = vpop.eup %1847 }
 0x96d   :  { %v1191_v25 = vmul.f32 %v1848_v34, %v1156_v46  ;;  %vm1196_vm14 = vweird.f32 %v1848_v34 }
 0x96e   :  { %vm1197_vm2 = vmor %vm1195_vm15, %vm1196_vm14 }
 0x96f   :  { %v1192_v48 = vsub.f32 1.0, %v1191_v25 }
 0x971   :  { %v1193_v50 = vmul.f32 %v1848_v34, %v1192_v48 }
 0x973   :  { %v1194_v53 = vadd.f32 %v1848_v34, %v1193_v50 }
 0x975   :  { %v1198_v57 = vsel %vm1197_vm2, %v1848_v34, %v1194_v53  ;;  %v1524_v53 = vperm.slane %v1854_v51, 4 }
 0x976   :  { %v1203_v60 = vsel %vm1200_vm3, %v1202_v55, %v1198_v57 }
 0x977   :  { %v1204_v7 = vmul.f32 %v2424_v52, %v1203_v60  ;;  %v1705_v52 = vld [vmem:[%s2610_s7 + $0x98] sm:$0xff]  ;;  %v1527_v60 = vperm.slane %v1854_v51, 5 }
 0x978   :  { %1464 = vmatpush.msrb.mxu1 %v1705_v52  ;;  %v1573_v52 = vld [vmem:[%s2613_s10 + $0x20] sm:$0xff] }
 0x979   :  { %1695 = vmatmul.msk.f32.gmra.mxu1 %vm356_vm9, %v1204_v7 }
 0x97a   :  { %1465 = vmatpush.msrb.mxu1 %v1704_v5 }
 0x97c   :  { %1466 = vmatpush.msrb.mxu1 %v1703_v8  ;;  %v1572_v8 = vld [vmem:[%s2613_s10 + $0x18] sm:$0xff] }
 0x97e   :  { %1467 = vmatpush.msrb.mxu1 %v1702_v62 }
 0x9ae   :  { %v1347_v1 = vpop.f32.mrf.mxu2 }
 0x9b7   :  { %v1405_v47 = vpop.f32.mrf.mxu0 }
 0x9b8   :  { %1429 = vrot.lane.b32.xlu2 %v1405_v47, %s1888_s3  ;;  %v1576_v47 = vld [vmem:[%s2613_s10 + $0x38] sm:$0xff] }
 0x9b9   :  { %1592 = vmatpush.msrb.mxu3 %v1576_v47 }
 0x9bf   :  { %v1408_v61 = vpop.f32.mrf.mxu0 }
 0x9c0   :  { %1413 = vrot.lane.b32.xlu2 %v1347_v1, %s1889_s21  ;;  %v1575_v1 = vld [vmem:[%s2613_s10 + $0x30] sm:$0xff] }
 0x9c1   :  { %1593 = vmatpush.msrb.mxu3 %v1575_v1 }
 0x9c3   :  { %v1376_v59 = vpop.f32.mrf.mxu3  ;;  %v1350_v4 = vpop.f32.mrf.mxu2 }
 0x9c8   :  { %1421 = vrot.lane.b32.xlu2 %v1376_v59, %s1890_s22 }
 0x9cb   :  { %v1379_v3 = vpop.f32.mrf.mxu3 }
 0x9cc   :  { %1423 = vrot.lane.b32.xlu0 %v1379_v3, %s1890_s22  ;;  %v1574_v3 = vld [vmem:[%s2613_s10 + $0x28] sm:$0xff] }
 0x9cd   :  { %1594 = vmatpush.msrb.mxu3 %v1574_v3 }
 0x9cf   :  { %1595 = vmatpush.msrb.mxu3 %v1573_v52 }
 0x9d0   :  { %1415 = vrot.lane.b32.xlu2 %v1350_v4, %s1889_s21 }
 0x9d1   :  { %1596 = vmatpush.msrb.mxu3 %v1572_v8 }
 0x9d8   :  { %1431 = vrot.lane.b32.xlu2 %v1408_v61, %s1888_s3 }
 0x9e1   :  { %v1318_v13 = vpop.f32.mrf.mxu1 }
 0x9f6   :  { %v1321_v28 = vpop.f32.mrf.mxu1 }
 0xa12   :  { %v1430_v11 = vpop.permute.xlu2 %1429 }
 0xa1a   :  { %v1414_v12 = vpop.permute.xlu2 %1413 }
 0xa1b   :  { %v1435_v14 = vsel %vm203_vm8, %v1318_v13, %v1414_v12 }
 0xa22   :  { %v1422_v15 = vpop.permute.xlu2 %1421 }
 0xa23   :  { %v1437_v44 = vsel %vm356_vm9, %v1435_v14, %v1422_v15 }
 0xa24   :  { %v1439_v16 = vsel %vm717_vm1, %v1437_v44, %v1430_v11 }
 0xa25   :  { %1706 = vmatmul.msk.f32.vlgmr.msrb.gmra.mxu1 %vm47_vm0, %v1439_v16 }
 0xa2a   :  { %v1416_v18 = vpop.permute.xlu2 %1415 }
 0xa2b   :  { %v1436_v20 = vsel %vm203_vm8, %v1321_v28, %v1416_v18  ;;  %v1571_v28 = vld [vmem:[%s2613_s10 + $0x10] sm:$0xff] }
 0xa2c   :  { %1597 = vmatpush.msrb.mxu3 %v1571_v28 }
 0xa32   :  { %v1432_v23 = vpop.permute.xlu2 %1431 }
 0xa3e   :  { %v1424_v22 = vpop.permute.xlu0 %1423 }
 0xa3f   :  { %v1438_v24 = vsel %vm356_vm9, %v1436_v20, %v1424_v22  ;;  %v1570_v20 = vld [vmem:[%s2613_s10 + $0x8] sm:$0xff]  ;;  %v1569_v22 = vld [vmem:[%s2613_s10] sm:$0xff]  ;;  %s1891_s10 = smov [#allocation2]  }
 0xa40   :  { %v1440_v21 = vsel %vm717_vm1, %v1438_v24, %v1432_v23  ;;  %1598 = vmatpush.msrb.mxu3 %v1570_v20  ;;  %v1774_v23 = vld [vmem:[%s2612_s9] ss:$0 sm:$0xff]  ;;  %s1618_s19 = sshll.u32 %s1891_s10, 4  ;;  %s1619_s19 = int_to_ptr.vmem [resolvable:$true] %s1618_s19 }
 0xa41   :  { %1707 = vmatmul.msk.f32.gmra.mxu1 %vm47_vm0, %v1440_v21 }
 0xa42   :  { %1599 = vmatpush.msrb.mxu3 %v1569_v22 }
 0xaa2   :  { %v1469_v58 = vpop.f32.mrf.mxu1 }
 0xaa3   :  { %v1475_v26 = vadd.f32 %v1469_v58, %v2266_v17 }
 0xaa5   :  { %v2533_v29 = vadd.f32 %v1477_v9, %v1475_v26 }
 0xaa7   :  { %v1480_v31 = vsel %vm47_vm0, %v2533_v29, 0.0 }
 0xaa8   :  { %1481 = vadd.xlane.f32.xlu1 %v1480_v31 }
 0xabe   :  { %v1472_v32 = vpop.f32.mrf.mxu1 }
 0xabf   :  { %v1476_v33 = vadd.f32 %v1472_v32, %v2271_v36  ;;  %v1609_v32 = vperm.slane %v2529_v63, 6 }
 0xac1   :  { %v2538_v37 = vadd.f32 %v1477_v9, %v1476_v33 }
 0xac3   :  { %v1483_v38 = vsel %vm47_vm0, %v2538_v37, 0.0 }
 0xac4   :  { %1484 = vadd.xlane.f32.xlu2 %v1483_v38 }
 0xb1b   :  { %v1482_v39 = vpop.xlane.xlu1 %1481 }
 0xb1c   :  { %v1486_v0 = vmul.f32 %v1482_v39, %v1967_v10 }
 0xb1e   :  { %v1488_v17 = vsub.f32 %v2533_v29, %v1486_v0 }
 0xb20   :  { %v1490_v56 = vmul.f32 %v1488_v17, %v1488_v17 }
 0xb22   :  { %v1492_v35 = vsel %vm47_vm0, %v1490_v56, 0.0 }
 0xb23   :  { %1493 = vadd.xlane.f32.xlu1 %v1492_v35 }
 0xb37   :  { %v1485_v19 = vpop.xlane.xlu2 %1484 }
 0xb38   :  { %v1487_v6 = vmul.f32 %v1485_v19, %v1967_v10 }
 0xb3a   :  { %v1489_v36 = vsub.f32 %v2538_v37, %v1487_v6 }
 0xb3c   :  { %v1491_v2 = vmul.f32 %v1489_v36, %v1489_v36 }
 0xb3e   :  { %v1495_v41 = vsel %vm47_vm0, %v1491_v2, 0.0 }
 0xb3f   :  { %1496 = vadd.xlane.f32.xlu0 %v1495_v41 }
 0xb96   :  { %v1494_v40 = vpop.xlane.xlu1 %1493 }
 0xb97   :  { %v1498_v45 = vmul.f32 %v1494_v40, %v1967_v10 }
 0xb99   :  { %v1500_v27 = vadd.f32 1e-06, %v1498_v45 }
 0xb9b   :  { %1849 = vrsqrt.f32 %v1500_v27  ;;  %vm1508_vm9 = vweird.f32 %v1500_v27 }
 0xba1   :  { %v1850_v46 = vpop.eup %1849 }
 0xba2   :  { %v1503_v34 = vmul.f32 %v1850_v46, %v1500_v27  ;;  %vm1509_vm8 = vweird.f32 %v1850_v46 }
 0xba3   :  { %vm1510_vm1 = vmor %vm1508_vm9, %vm1509_vm8 }
 0xba4   :  { %v1504_v25 = vmul.f32 %v1850_v46, %v1503_v34 }
 0xba6   :  { %v1505_v48 = vmul.f32 0.5, %v1504_v25 }
 0xba8   :  { %v1506_v49 = vsub.f32 1.5, %v1505_v48 }
 0xbaa   :  { %v1507_v50 = vmul.f32 %v1850_v46, %v1506_v49 }
 0xbac   :  { %v1511_v55 = vsel %vm1510_vm1, %v1850_v46, %v1507_v50 }
 0xbad   :  { %v1522_v57 = vmul.f32 %v1511_v55, %v1488_v17 }
 0xbaf   :  { %v1525_v7 = vmul.f32 %v1524_v53, %v1522_v57 }
 0xbb1   :  { %v1528_v59 = vadd.f32 %v1527_v60, %v1525_v7 }
 0xbb2   :  { %v1497_v4 = vpop.xlane.xlu0 %1496 }
 0xbb3   :  { %v1499_v61 = vmul.f32 %v1497_v4, %v1967_v10  ;;  %1708 = vmatmul.msk.f32.vlgmr.msrb.gmra.mxu2 %vm47_vm0, %v1528_v59 }
 0xbb5   :  { %v1501_v5 = vadd.f32 1e-06, %v1499_v61 }
 0xbb7   :  { %1851 = vrsqrt.f32 %v1501_v5  ;;  %vm1518_vm5 = vweird.f32 %v1501_v5 }
 0xbbd   :  { %v1852_v62 = vpop.eup %1851 }
 0xbbe   :  { %v1513_v11 = vmul.f32 %v1852_v62, %v1501_v5  ;;  %vm1519_vm4 = vweird.f32 %v1852_v62 }
 0xbbf   :  { %vm1520_vm6 = vmor %vm1518_vm5, %vm1519_vm4 }
 0xbc0   :  { %v1514_v12 = vmul.f32 %v1852_v62, %v1513_v11 }
 0xbc2   :  { %v1515_v13 = vmul.f32 0.5, %v1514_v12 }
 0xbc4   :  { %v1516_v10 = vsub.f32 1.5, %v1515_v13 }
 0xbc6   :  { %v1517_v14 = vmul.f32 %v1852_v62, %v1516_v10 }
 0xbc8   :  { %v1521_v15 = vsel %vm1520_vm6, %v1852_v62, %v1517_v14 }
 0xbc9   :  { %v1523_v44 = vmul.f32 %v1521_v15, %v1489_v36 }
 0xbcb   :  { %v1526_v16 = vmul.f32 %v1524_v53, %v1523_v44 }
 0xbcd   :  { %v1529_v18 = vadd.f32 %v1527_v60, %v1526_v16 }
 0xbcf   :  { %1709 = vmatmul.msk.f32.gmra.mxu2 %vm47_vm0, %v1529_v18 }
 0xc36   :  { %v1561_v24 = vpop.f32.mrf.mxu2 }
 0xc37   :  { %v1562_v21 = vadd.f32 %v1774_v23, %v1561_v24 }
 0xc39   :  { %v1567_v9 = vmax.f32 %v1562_v21, 0.0 }
 0xc3b   :  { %1710 = vmatmul.msk.f32.vlgmr.msrb.gmra.mxu3 %vm1577_vm7, %v1567_v9 }
 0xc52   :  { %v1564_v58 = vpop.f32.mrf.mxu2 }
 0xc53   :  { %v1565_v26 = vadd.f32 %v1774_v23, %v1564_v58 }
 0xc55   :  { %v1568_v31 = vmax.f32 %v1565_v26, 0.0 }
 0xc57   :  { %1711 = vmatmul.msk.f32.gmra.mxu3 %vm1577_vm7, %v1568_v31 }
 0xcbe   :  { %v1601_v33 = vpop.f32.mrf.mxu3 }
 0xcbf   :  { %v1607_v38 = vadd.f32 %v1601_v33, %v2533_v29 }
 0xcc1   :  { %v1610_v39 = vadd.f32 %v1609_v32, %v1607_v38 }
 0xcc3   :  { %1612 = vst.msk [vmem:[#allocation2] sm:$0xff] %vm47_vm0, %v1610_v39 }
 0xcda   :  { %v1604_v0 = vpop.f32.mrf.mxu3 }
 0xcdb   :  { %v1608_v17 = vadd.f32 %v1604_v0, %v2538_v37 }
 0xcdd   :  { %v1611_v56 = vadd.f32 %v1609_v32, %v1608_v17 }
 0xcdf   :  { %1613 = vst.msk [vmem:[#allocation2 + $0x8] sm:$0xff] %vm47_vm0, %v1611_v56 }
 0xce0   :  { %1626 = dma.vmem_to_hbm [thread:$0]  %s1619_s19, 256, %s1621_s0, [#allocation3], %s1892_s23, %s1892_s23, %s1889_s21  }
 0xce1   :  { %1879 = dma.done.wait [#allocation3], 256  }
 0xce2   :  { %1880 = vsyncadd [#allocation3], 4294967040 }
 0xce3   :  { %1631 = vsyncpa [#allocation3], 1 }

</bundles_post_ra>
